<compile_context>
chip_gen: v6e
topology: v6e:2x2x1
jax: 0.10.0
libtpu: 0.0.40
codegen_flags: <defaults>
</compile_context>

<pallas_src>
import functools

import jax
import jax.numpy as jnp
import numpy as np
from jax.experimental import pallas as pl
from jax.experimental.pallas import tpu as pltpu

# ----------------------------- hyper-params ---------------------------------
D_TEXT = 128      # text encoder hidden size (CLS feature dim)
D_TAB = 64        # tabular_dim
HID = 128         # hidden_dim
NUM_LABELS = 2
LOGITS_PAD = 128  # lane-dense padded logits width
N_LAYERS = 2      # self_attention_layers
FUSION = D_TEXT + HID          # fusion_dim = text_hidden + hidden_dim
FFN = FUSION * 2               # dim_feedforward
EPS = 1e-5
MAX_TILE_B = 128               # batch tile cap (saturates MXU rows on v5e;
                               # still fine on v6e/v7x and trivially fits VMEM)

# TODO(synk): the HuggingFace text/vision/audio/time-series encoders have no
# Pallas equivalent; the kernel takes the pooled text feature (B, D_TEXT) as
# a direct input instead of running AutoModel.

# ---- packed f32 vector-slab layout (each row = one (1,N) bias/LN vector) ----
VEC_W = FFN                        # 512, widest vector (ff1 bias)
R_TE_B = 0
R_TE_LN_G = 1
R_TE_LN_B = 2
R_LAYER0 = 3
ROWS_PER_LAYER = 7                 # attn_b, ln1_g, ln1_b, ff1_b, ff2_b, ln2_g, ln2_b
R_FH_B = R_LAYER0 + N_LAYERS * ROWS_PER_LAYER        # 17
R_CLS_B = R_FH_B + 1                                 # 18
VEC_ROWS = ((R_CLS_B + 1 + 7) // 8) * 8              # 24 (multiple of 8)

# ---- packed bf16 small-weight slab (all share out-dim 128, concat on rows) ----
SMW_TE0, SMW_TE1 = 0, D_TAB                          # te_w   (64, 128)
SMW_FH0, SMW_FH1 = SMW_TE1, SMW_TE1 + FUSION         # fh_w   (256, 128)
SMW_CLS0, SMW_CLS1 = SMW_FH1, SMW_FH1 + HID          # cls_w  (128, 128)
SMW_ROWS = SMW_CLS1                                  # 448 (multiple of 16)


def _round_up(n, m):
    return ((n + m - 1) // m) * m


def _layernorm(x, g, b):
    m = jnp.mean(x, axis=-1, keepdims=True)
    v = jnp.mean((x - m) ** 2, axis=-1, keepdims=True)
    return (x - m) * jax.lax.rsqrt(v + EPS) * g + b


def _layernorm_noaffine(x):
    m = jnp.mean(x, axis=-1, keepdims=True)
    v = jnp.mean((x - m) ** 2, axis=-1, keepdims=True)
    return (x - m) * jax.lax.rsqrt(v + EPS)


def _gelu_exact(x):
    # PyTorch F.gelu default (erf-based) -- used only by the f32 reference.
    return 0.5 * x * (1.0 + jax.lax.erf(x * (1.0 / jnp.sqrt(2.0).astype(x.dtype))))


def _gelu_tanh(x):
    # tanh-approximate GELU: single EUP transcendental per element.
    return jax.nn.gelu(x, approximate=True)


# ------------------------------- kernel --------------------------------------
def stock_predictor_kernel(
    text_ref, tab_ref,          # streamed activations (tile_b rows)
    vec_ref,                    # f32 (VEC_ROWS, 512)  all biases / LN params
    smw_ref,                    # bf16 (448, 128)      te_w | fh_w | cls_w
    awff2_ref,                  # bf16 (L, 768, 256)   attn_w | ff2_w
    ff1_ref,                    # bf16 (L, 256, 512)   ff1_w
    logits_ref,                 # f32 (tile_b, 128)    lane-dense padded output
):
    f32 = jnp.float32

    def vrow(r, w):
        return vec_ref[r:r + 1, 0:w]        # static slice -> free ref view

    text_feat = text_ref[...]               # (T, D_TEXT) f32
    tab = tab_ref[...]                      # (T, D_TAB)  f32

    te_w = smw_ref[SMW_TE0:SMW_TE1, :]      # (64, 128)  bf16, BN folded
    fh_w = smw_ref[SMW_FH0:SMW_FH1, :]      # (256, 128) bf16, BN + ln2[last] folded
    cls_w = smw_ref[SMW_CLS0:SMW_CLS1, :]   # (128, 128) bf16, fh_ln folded, padded

    # ---- tabular encoder: Linear(+BN folded) -> ReLU -> Dropout(id) -> LN ----
    h = jnp.dot(tab.astype(jnp.bfloat16), te_w,
                preferred_element_type=f32) + vrow(R_TE_B, HID)
    h = jnp.maximum(h, 0.0)
    h = _layernorm(h, vrow(R_TE_LN_G, HID), vrow(R_TE_LN_B, HID))   # (T, HID)

    # ---- concat fusion (both halves 128-lane aligned -> plain vreg copies) ----
    x = jnp.concatenate([text_feat, h], axis=-1)                    # (T, FUSION)

    # ---- transformer encoder, seq_len = 1, post-norm, gelu ----
    for l in range(N_LAYERS):
        base = R_LAYER0 + l * ROWS_PER_LAYER
        attn_w = awff2_ref[l, 0:FUSION, :]              # (256, 256)
        ff2_w = awff2_ref[l, FUSION:FUSION + FFN, :]    # (512, 256)
        ff1_w = ff1_ref[l]                              # (256, 512)

        # softmax over a length-1 key sequence is identically 1, so MHA(x)
        # reduces to out_proj(v_proj(x)); folded into attn_w/attn_b on host.
        attn = jnp.dot(x.astype(jnp.bfloat16), attn_w,
                       preferred_element_type=f32) + vrow(base + 0, FUSION)
        x = _layernorm(x + attn, vrow(base + 1, FUSION), vrow(base + 2, FUSION))

        ff = jnp.dot(x.astype(jnp.bfloat16), ff1_w,
                     preferred_element_type=f32) + vrow(base + 3, FFN)
        ff = _gelu_tanh(ff)
        ff = jnp.dot(ff.astype(jnp.bfloat16), ff2_w,
                     preferred_element_type=f32) + vrow(base + 4, FUSION)
        if l < N_LAYERS - 1:
            x = _layernorm(x + ff, vrow(base + 5, FUSION), vrow(base + 6, FUSION))
        else:
            # last ln2 affine folded into fh_w / fh_b on the host
            x = _layernorm_noaffine(x + ff)

    # ---- fusion head: Linear(+BN+ln2 folded) -> ReLU -> LN -> Linear ----
    z = jnp.dot(x.astype(jnp.bfloat16), fh_w,
                preferred_element_type=f32) + vrow(R_FH_B, HID)
    z = jnp.maximum(z, 0.0)
    z = _layernorm_noaffine(z)              # fh_ln affine folded into cls_w/cls_b

    # lane-dense (T, 128) store; wrapper slices the first NUM_LABELS columns
    logits = jnp.dot(z.astype(jnp.bfloat16), cls_w,
                     preferred_element_type=f32) + vrow(R_CLS_B, LOGITS_PAD)
    logits_ref[...] = logits.astype(logits_ref.dtype)


# ----------------------------- parameters -----------------------------------
def init_params(key):
    """Deterministic synthetic 'module' parameters (shapes follow nn.Module)."""
    ks = iter(jax.random.split(key, 64))
    s = 0.05

    def w(shape):
        return jax.random.normal(next(ks), shape, jnp.float32) * s

    p = {}
    # tabular encoder
    p["te_w"] = w((D_TAB, HID))
    p["te_b"] = w((1, HID))
    p["te_bn_g"] = 1.0 + w((1, HID))
    p["te_bn_b"] = w((1, HID))
    p["te_bn_m"] = w((1, HID))
    p["te_bn_v"] = 1.0 + jnp.abs(w((1, HID)))
    p["te_ln_g"] = 1.0 + w((1, HID))
    p["te_ln_b"] = w((1, HID))
    # transformer encoder layers (stacked on axis 0)
    p["qkv_w"] = w((N_LAYERS, FUSION, 3 * FUSION))
    p["qkv_b"] = w((N_LAYERS, 1, 3 * FUSION))
    p["ao_w"] = w((N_LAYERS, FUSION, FUSION))
    p["ao_b"] = w((N_LAYERS, 1, FUSION))
    p["ln1_g"] = 1.0 + w((N_LAYERS, 1, FUSION))
    p["ln1_b"] = w((N_LAYERS, 1, FUSION))
    p["ff1_w"] = w((N_LAYERS, FUSION, FFN))
    p["ff1_b"] = w((N_LAYERS, 1, FFN))
    p["ff2_w"] = w((N_LAYERS, FFN, FUSION))
    p["ff2_b"] = w((N_LAYERS, 1, FUSION))
    p["ln2_g"] = 1.0 + w((N_LAYERS, 1, FUSION))
    p["ln2_b"] = w((N_LAYERS, 1, FUSION))
    # fusion head
    p["fh_w"] = w((FUSION, HID))
    p["fh_b"] = w((1, HID))
    p["fh_bn_g"] = 1.0 + w((1, HID))
    p["fh_bn_b"] = w((1, HID))
    p["fh_bn_m"] = w((1, HID))
    p["fh_bn_v"] = 1.0 + jnp.abs(w((1, HID)))
    p["fh_ln_g"] = 1.0 + w((1, HID))
    p["fh_ln_b"] = w((1, HID))
    p["cls_w"] = w((HID, NUM_LABELS))
    p["cls_b"] = w((1, NUM_LABELS))
    return p


def prepare_params(p):
    """Host-side folding / packing of module params into 4 kernel slabs.

    * BatchNorm (eval) folded into the adjacent Linear (exact).
    * v_proj ∘ out_proj folded into one (FUSION, FUSION) matrix per layer
      (exact because seq_len == 1 makes the attention weights identically 1).
    * Last layer's ln2 affine folded into fh_w/fh_b; fh_ln affine folded into
      cls_w/cls_b (exact: LN-affine -> Linear is a diagonal row-rescale).
    * Weight matrices cast to bf16 (after f32 folding); biases/LN params f32.
    * Classifier zero-padded to LOGITS_PAD lanes for a lane-dense store.
    """
    def bn_fold(w, b, g, beta, m, v):
        s = g / jnp.sqrt(v + EPS)                       # (1, out)
        return w * s, (b - m) * s + beta                # f32

    # tabular encoder
    te_w, te_b = bn_fold(p["te_w"], p["te_b"], p["te_bn_g"],
                         p["te_bn_b"], p["te_bn_m"], p["te_bn_v"])

    # attention: keep only V block of in_proj and fold with out_proj
    wv = p["qkv_w"][:, :, 2 * FUSION:]                  # (L, FUSION, FUSION)
    bv = p["qkv_b"][:, :, 2 * FUSION:]                  # (L, 1, FUSION)
    attn_w = jnp.einsum("lij,ljk->lik", wv, p["ao_w"])  # f32
    attn_b = jnp.einsum("lij,ljk->lik", bv, p["ao_w"]) + p["ao_b"]

    # fusion head: BN fold, then fold last layer's ln2 affine into it
    fh_w, fh_b = bn_fold(p["fh_w"], p["fh_b"], p["fh_bn_g"],
                         p["fh_bn_b"], p["fh_bn_m"], p["fh_bn_v"])
    g2 = p["ln2_g"][N_LAYERS - 1]                       # (1, FUSION)
    b2 = p["ln2_b"][N_LAYERS - 1]                       # (1, FUSION)
    fh_b = b2 @ fh_w + fh_b                             # (1, HID)
    fh_w = fh_w * g2.reshape(FUSION, 1)                 # row-scale

    # classifier: fold fh_ln affine, pad to lane-dense width
    cls_b = p["fh_ln_b"] @ p["cls_w"] + p["cls_b"]      # (1, NUM_LABELS)
    cls_w = p["cls_w"] * p["fh_ln_g"].reshape(HID, 1)   # (HID, NUM_LABELS)
    cls_w_p = jnp.zeros((HID, LOGITS_PAD), jnp.float32).at[:, :NUM_LABELS].set(cls_w)
    cls_b_p = jnp.zeros((1, LOGITS_PAD), jnp.float32).at[:, :NUM_LABELS].set(cls_b)

    # ---- f32 vector slab: one row per bias / LN parameter vector ----
    vec = jnp.zeros((VEC_ROWS, VEC_W), jnp.float32)

    def put(v_slab, r, v):
        v = v.reshape(1, -1)
        return v_slab.at[r:r + 1, :v.shape[1]].set(v)

    vec = put(vec, R_TE_B, te_b)
    vec = put(vec, R_TE_LN_G, p["te_ln_g"])
    vec = put(vec, R_TE_LN_B, p["te_ln_b"])
    for l in range(N_LAYERS):
        base = R_LAYER0 + l * ROWS_PER_LAYER
        vec = put(vec, base + 0, attn_b[l])
        vec = put(vec, base + 1, p["ln1_g"][l])
        vec = put(vec, base + 2, p["ln1_b"][l])
        vec = put(vec, base + 3, p["ff1_b"][l])
        vec = put(vec, base + 4, p["ff2_b"][l])
        if l < N_LAYERS - 1:                            # last layer's ln2 is folded
            vec = put(vec, base + 5, p["ln2_g"][l])
            vec = put(vec, base + 6, p["ln2_b"][l])
    vec = put(vec, R_FH_B, fh_b)
    vec = put(vec, R_CLS_B, cls_b_p)

    # ---- bf16 small-weight slab (shared out-dim 128, concat along rows) ----
    small_w = jnp.concatenate([te_w, fh_w, cls_w_p], axis=0).astype(jnp.bfloat16)

    # ---- bf16 big per-layer slabs ----
    aw_ff2 = jnp.concatenate([attn_w, p["ff2_w"]], axis=1).astype(jnp.bfloat16)  # (L,768,256)
    ff1_w = p["ff1_w"].astype(jnp.bfloat16)                                      # (L,256,512)

    return {"vec_slab": vec, "small_w": small_w, "aw_ff2": aw_ff2, "ff1_w": ff1_w}


PREP_ORDER = ["vec_slab", "small_w", "aw_ff2", "ff1_w"]


# ------------------------------- wrapper --------------------------------------
@functools.partial(jax.jit, static_argnums=(3,))
def _predict_jit(text_feat, tabular_inputs, prepped, tile_b):
    b = text_feat.shape[0]
    b_pad = _round_up(b, tile_b)
    if b_pad != b:
        text_feat = jnp.pad(text_feat, ((0, b_pad - b), (0, 0)))
        tabular_inputs = jnp.pad(tabular_inputs, ((0, b_pad - b), (0, 0)))
    grid = (b_pad // tile_b,)

    weight_specs = [
        pl.BlockSpec((VEC_ROWS, VEC_W), lambda i: (0, 0)),               # vec_slab
        pl.BlockSpec((SMW_ROWS, HID), lambda i: (0, 0)),                 # small_w
        pl.BlockSpec((N_LAYERS, FUSION + FFN, FUSION), lambda i: (0, 0, 0)),  # aw_ff2
        pl.BlockSpec((N_LAYERS, FUSION, FFN), lambda i: (0, 0, 0)),      # ff1_w
    ]
    padded = pl.pallas_call(
        stock_predictor_kernel,
        out_shape=jax.ShapeDtypeStruct((b_pad, LOGITS_PAD), jnp.float32),
        grid=grid,
        in_specs=[
            pl.BlockSpec((tile_b, D_TEXT), lambda i: (i, 0)),
            pl.BlockSpec((tile_b, D_TAB), lambda i: (i, 0)),
            *weight_specs,
        ],
        out_specs=pl.BlockSpec((tile_b, LOGITS_PAD), lambda i: (i, 0)),
        compiler_params=pltpu.CompilerParams(
            dimension_semantics=("parallel",)),   # shards batch tiles across TCs on v7x
    )(text_feat, tabular_inputs, *[prepped[k] for k in PREP_ORDER])
    return padded[:b, :NUM_LABELS]


def multimodal_stock_predictor(text_feat, tabular_inputs, prepped, tile_b=None):
    """Pallas forward pass.  Batch is tiled along a 'parallel' grid axis; the
    ~1.4 MB of bf16 weights is DMA'd once (index_map -> 0) and stays
    VMEM-resident across batch tiles.  Assumes the transformer sees a
    length-1 sequence (as the module's forward always does)."""
    b = text_feat.shape[0]
    if tile_b is None:
        tile_b = min(MAX_TILE_B, _round_up(b, 8))
    tile_b = _round_up(int(tile_b), 8)
    return _predict_jit(text_feat, tabular_inputs, prepped, tile_b)


# ----------------------------- reference ------------------------------------
def reference(text_feat, tab, p):
    """Pure-JAX f32 reference mirroring the PyTorch eval-mode forward
    (un-folded BN, full in_proj, erf-GELU, exact attention on a len-1 seq)."""
    h = tab @ p["te_w"] + p["te_b"]
    h = (h - p["te_bn_m"]) / jnp.sqrt(p["te_bn_v"] + EPS) * p["te_bn_g"] + p["te_bn_b"]
    h = jnp.maximum(h, 0.0)
    h = _layernorm(h, p["te_ln_g"], p["te_ln_b"])
    x = jnp.concatenate([text_feat, h], axis=-1)
    for l in range(N_LAYERS):
        qkv = x @ p["qkv_w"][l] + p["qkv_b"][l]
        v = qkv[:, 2 * FUSION:]                     # softmax over len-1 seq == 1
        attn = v @ p["ao_w"][l] + p["ao_b"][l]
        x = _layernorm(x + attn, p["ln1_g"][l], p["ln1_b"][l])
        ff = x @ p["ff1_w"][l] + p["ff1_b"][l]
        ff = _gelu_exact(ff)
        ff = ff @ p["ff2_w"][l] + p["ff2_b"][l]
        x = _layernorm(x + ff, p["ln2_g"][l], p["ln2_b"][l])
    z = x @ p["fh_w"] + p["fh_b"]
    z = (z - p["fh_bn_m"]) / jnp.sqrt(p["fh_bn_v"] + EPS) * p["fh_bn_g"] + p["fh_bn_b"]
    z = jnp.maximum(z, 0.0)
    z = _layernorm(z, p["fh_ln_g"], p["fh_ln_b"])
    return z @ p["cls_w"] + p["cls_b"]


if __name__ == "__main__":
    key = jax.random.PRNGKey(0)
    k_text, k_tab, k_param, k_text2, k_tab2 = jax.random.split(key, 5)

    params = init_params(k_param)
    prepped = prepare_params(params)   # host-side fold / bf16 pack, done once

    # ---- small single-tile test (B=8) ----
    B = 8
    text_feat = jax.random.normal(k_text, (B, D_TEXT), jnp.float32)      # text CLS feature
    tabular_inputs = jax.random.normal(k_tab, (B, D_TAB), jnp.float32)   # tabular features

    logits = multimodal_stock_predictor(text_feat, tabular_inputs, prepped)
    logits = jax.block_until_ready(logits)

    ref = reference(text_feat, tabular_inputs, params)
    # bf16 weights + tanh-GELU => loosened tolerances vs. the f32/erf reference.
    np.testing.assert_allclose(np.asarray(logits), np.asarray(ref), rtol=5e-2, atol=5e-2)
    assert logits.shape == (B, NUM_LABELS)

    # ---- multi-tile grid test (B=20, tile_b=8 -> grid of 3 with 4 padded rows) ----
    B2 = 20
    text2 = jax.random.normal(k_text2, (B2, D_TEXT), jnp.float32)
    tab2 = jax.random.normal(k_tab2, (B2, D_TAB), jnp.float32)
    logits2 = multimodal_stock_predictor(text2, tab2, prepped, tile_b=8)
    logits2 = jax.block_until_ready(logits2)
    ref2 = reference(text2, tab2, params)
    np.testing.assert_allclose(np.asarray(logits2), np.asarray(ref2), rtol=5e-2, atol=5e-2)
    assert logits2.shape == (B2, NUM_LABELS)

    print("KERNEL_OK")
</pallas_src>

<mosaic_0001>
module attributes {stable_mosaic.version = 11 : i64} {
  func.func @stock_predictor_kernel(%arg0: i32, %arg1: memref<8x128xf32, #tpu.memory_space<vmem>>, %arg2: memref<8x64xf32, #tpu.memory_space<vmem>>, %arg3: memref<24x512xf32, #tpu.memory_space<vmem>>, %arg4: memref<448x128xbf16, #tpu.memory_space<vmem>>, %arg5: memref<2x768x256xbf16, #tpu.memory_space<vmem>>, %arg6: memref<2x256x512xbf16, #tpu.memory_space<vmem>>, %arg7: memref<8x128xf32, #tpu.memory_space<vmem>>) attributes {dimension_semantics = [#tpu.dimension_semantics<parallel>], iteration_bounds = array<i64: 1>, scalar_prefetch = 0 : i64, scratch_operands = 0 : i64, tpu.core_type = #tpu.core_type<tc>, window_params = [{transform_indices = @transform_0, window_bounds = array<i64: 8, 128>}, {transform_indices = @transform_1, window_bounds = array<i64: 8, 64>}, {pipeline_mode = #tpu.pipeline_mode<synchronous>, transform_indices = @transform_2, window_bounds = array<i64: 24, 512>}, {pipeline_mode = #tpu.pipeline_mode<synchronous>, transform_indices = @transform_3, window_bounds = array<i64: 448, 128>}, {pipeline_mode = #tpu.pipeline_mode<synchronous>, transform_indices = @transform_4, window_bounds = array<i64: 2, 768, 256>}, {pipeline_mode = #tpu.pipeline_mode<synchronous>, transform_indices = @transform_5, window_bounds = array<i64: 2, 256, 512>}, {transform_indices = @transform_6, window_bounds = array<i64: 8, 128>}]} {
    %c0 = arith.constant 0 : index
    %c0_0 = arith.constant 0 : index
    %0 = vector.load %arg1[%c0, %c0_0] : memref<8x128xf32, #tpu.memory_space<vmem>>, vector<8x128xf32>
    %c0_1 = arith.constant 0 : index
    %c0_2 = arith.constant 0 : index
    %1 = vector.load %arg2[%c0_1, %c0_2] : memref<8x64xf32, #tpu.memory_space<vmem>>, vector<8x64xf32>
    %c0_3 = arith.constant 0 : index
    %c0_4 = arith.constant 0 : index
    %2 = vector.load %arg4[%c0_3, %c0_4] : memref<448x128xbf16, #tpu.memory_space<vmem>>, vector<64x128xbf16>
    %c64 = arith.constant 64 : index
    %c0_5 = arith.constant 0 : index
    %3 = vector.load %arg4[%c64, %c0_5] : memref<448x128xbf16, #tpu.memory_space<vmem>>, vector<256x128xbf16>
    %c320 = arith.constant 320 : index
    %c0_6 = arith.constant 0 : index
    %4 = vector.load %arg4[%c320, %c0_6] : memref<448x128xbf16, #tpu.memory_space<vmem>>, vector<128x128xbf16>
    %5 = arith.truncf %1 : vector<8x64xf32> to vector<8x64xbf16>
    %cst = arith.constant dense<0.000000e+00> : vector<8x128xf32>
    %6 = tpu.matmul %5, %2, %cst {dimension_numbers = #tpu.dot_dimension_numbers<[1], [0], [0], [1], [0, 0, 1, 1], [], []>} : vector<8x64xbf16>, vector<64x128xbf16>, vector<8x128xf32> -> vector<8x128xf32>
    %c0_7 = arith.constant 0 : index
    %c0_8 = arith.constant 0 : index
    %7 = vector.load %arg3[%c0_7, %c0_8] : memref<24x512xf32, #tpu.memory_space<vmem>>, vector<1x128xf32>
    %8 = vector.broadcast %7 : vector<1x128xf32> to vector<8x128xf32>
    %9 = arith.addf %6, %8 : vector<8x128xf32>
    %cst_9 = arith.constant 0.000000e+00 : f32
    %10 = vector.broadcast %cst_9 : f32 to vector<8x128xf32>
    %11 = arith.maximumf %9, %10 : vector<8x128xf32>
    %c1 = arith.constant 1 : index
    %c0_10 = arith.constant 0 : index
    %12 = vector.load %arg3[%c1, %c0_10] : memref<24x512xf32, #tpu.memory_space<vmem>>, vector<1x128xf32>
    %c2 = arith.constant 2 : index
    %c0_11 = arith.constant 0 : index
    %13 = vector.load %arg3[%c2, %c0_11] : memref<24x512xf32, #tpu.memory_space<vmem>>, vector<1x128xf32>
    %cst_12 = arith.constant dense<0.000000e+00> : vector<8xf32>
    %14 = vector.multi_reduction <add>, %11, %cst_12 [1] : vector<8x128xf32> to vector<8xf32>
    %15 = vector.shape_cast %14 : vector<8xf32> to vector<8x1xf32>
    %cst_13 = arith.constant 1.280000e+02 : f32
    %16 = vector.broadcast %cst_13 : f32 to vector<8x1xf32>
    %17 = arith.divf %15, %16 : vector<8x1xf32>
    %18 = vector.broadcast %17 : vector<8x1xf32> to vector<8x128xf32>
    %19 = arith.subf %11, %18 : vector<8x128xf32>
    %20 = arith.mulf %19, %19 : vector<8x128xf32>
    %cst_14 = arith.constant dense<0.000000e+00> : vector<8xf32>
    %21 = vector.multi_reduction <add>, %20, %cst_14 [1] : vector<8x128xf32> to vector<8xf32>
    %22 = vector.shape_cast %21 : vector<8xf32> to vector<8x1xf32>
    %cst_15 = arith.constant 1.280000e+02 : f32
    %23 = vector.broadcast %cst_15 : f32 to vector<8x1xf32>
    %24 = arith.divf %22, %23 : vector<8x1xf32>
    %25 = vector.broadcast %17 : vector<8x1xf32> to vector<8x128xf32>
    %26 = arith.subf %11, %25 : vector<8x128xf32>
    %cst_16 = arith.constant 9.99999974E-6 : f32
    %27 = vector.broadcast %cst_16 : f32 to vector<8x1xf32>
    %28 = arith.addf %24, %27 : vector<8x1xf32>
    %29 = math.rsqrt %28 : vector<8x1xf32>
    %30 = vector.broadcast %29 : vector<8x1xf32> to vector<8x128xf32>
    %31 = arith.mulf %26, %30 : vector<8x128xf32>
    %32 = vector.broadcast %12 : vector<1x128xf32> to vector<8x128xf32>
    %33 = arith.mulf %31, %32 : vector<8x128xf32>
    %34 = vector.broadcast %13 : vector<1x128xf32> to vector<8x128xf32>
    %35 = arith.addf %33, %34 : vector<8x128xf32>
    %36 = tpu.concatenate %0, %35 in 1 : vector<8x128xf32>, vector<8x128xf32> -> vector<8x256xf32>
    %c0_17 = arith.constant 0 : index
    %c0_18 = arith.constant 0 : index
    %c0_19 = arith.constant 0 : index
    %37 = vector.load %arg5[%c0_17, %c0_18, %c0_19] : memref<2x768x256xbf16, #tpu.memory_space<vmem>>, vector<1x256x256xbf16>
    %38 = vector.shape_cast %37 : vector<1x256x256xbf16> to vector<256x256xbf16>
    %c0_20 = arith.constant 0 : index
    %c256 = arith.constant 256 : index
    %c0_21 = arith.constant 0 : index
    %39 = vector.load %arg5[%c0_20, %c256, %c0_21] : memref<2x768x256xbf16, #tpu.memory_space<vmem>>, vector<1x512x256xbf16>
    %40 = vector.shape_cast %39 : vector<1x512x256xbf16> to vector<512x256xbf16>
    %c0_22 = arith.constant 0 : index
    %c0_23 = arith.constant 0 : index
    %c0_24 = arith.constant 0 : index
    %41 = vector.load %arg6[%c0_22, %c0_23, %c0_24] : memref<2x256x512xbf16, #tpu.memory_space<vmem>>, vector<1x256x512xbf16>
    %42 = vector.shape_cast %41 : vector<1x256x512xbf16> to vector<256x512xbf16>
    %43 = arith.truncf %36 : vector<8x256xf32> to vector<8x256xbf16>
    %cst_25 = arith.constant dense<0.000000e+00> : vector<8x256xf32>
    %44 = tpu.matmul %43, %38, %cst_25 {dimension_numbers = #tpu.dot_dimension_numbers<[1], [0], [0], [1], [0, 0, 1, 1], [], []>} : vector<8x256xbf16>, vector<256x256xbf16>, vector<8x256xf32> -> vector<8x256xf32>
    %c3 = arith.constant 3 : index
    %c0_26 = arith.constant 0 : index
    %45 = vector.load %arg3[%c3, %c0_26] : memref<24x512xf32, #tpu.memory_space<vmem>>, vector<1x256xf32>
    %46 = vector.broadcast %45 : vector<1x256xf32> to vector<8x256xf32>
    %47 = arith.addf %44, %46 : vector<8x256xf32>
    %48 = arith.addf %36, %47 : vector<8x256xf32>
    %c4 = arith.constant 4 : index
    %c0_27 = arith.constant 0 : index
    %49 = vector.load %arg3[%c4, %c0_27] : memref<24x512xf32, #tpu.memory_space<vmem>>, vector<1x256xf32>
    %c5 = arith.constant 5 : index
    %c0_28 = arith.constant 0 : index
    %50 = vector.load %arg3[%c5, %c0_28] : memref<24x512xf32, #tpu.memory_space<vmem>>, vector<1x256xf32>
    %cst_29 = arith.constant dense<0.000000e+00> : vector<8xf32>
    %51 = vector.multi_reduction <add>, %48, %cst_29 [1] : vector<8x256xf32> to vector<8xf32>
    %52 = vector.shape_cast %51 : vector<8xf32> to vector<8x1xf32>
    %cst_30 = arith.constant 2.560000e+02 : f32
    %53 = vector.broadcast %cst_30 : f32 to vector<8x1xf32>
    %54 = arith.divf %52, %53 : vector<8x1xf32>
    %55 = vector.broadcast %54 : vector<8x1xf32> to vector<8x256xf32>
    %56 = arith.subf %48, %55 : vector<8x256xf32>
    %57 = arith.mulf %56, %56 : vector<8x256xf32>
    %cst_31 = arith.constant dense<0.000000e+00> : vector<8xf32>
    %58 = vector.multi_reduction <add>, %57, %cst_31 [1] : vector<8x256xf32> to vector<8xf32>
    %59 = vector.shape_cast %58 : vector<8xf32> to vector<8x1xf32>
    %cst_32 = arith.constant 2.560000e+02 : f32
    %60 = vector.broadcast %cst_32 : f32 to vector<8x1xf32>
    %61 = arith.divf %59, %60 : vector<8x1xf32>
    %62 = vector.broadcast %54 : vector<8x1xf32> to vector<8x256xf32>
    %63 = arith.subf %48, %62 : vector<8x256xf32>
    %cst_33 = arith.constant 9.99999974E-6 : f32
    %64 = vector.broadcast %cst_33 : f32 to vector<8x1xf32>
    %65 = arith.addf %61, %64 : vector<8x1xf32>
    %66 = math.rsqrt %65 : vector<8x1xf32>
    %67 = vector.broadcast %66 : vector<8x1xf32> to vector<8x256xf32>
    %68 = arith.mulf %63, %67 : vector<8x256xf32>
    %69 = vector.broadcast %49 : vector<1x256xf32> to vector<8x256xf32>
    %70 = arith.mulf %68, %69 : vector<8x256xf32>
    %71 = vector.broadcast %50 : vector<1x256xf32> to vector<8x256xf32>
    %72 = arith.addf %70, %71 : vector<8x256xf32>
    %73 = arith.truncf %72 : vector<8x256xf32> to vector<8x256xbf16>
    %cst_34 = arith.constant dense<0.000000e+00> : vector<8x512xf32>
    %74 = tpu.matmul %73, %42, %cst_34 {dimension_numbers = #tpu.dot_dimension_numbers<[1], [0], [0], [1], [0, 0, 1, 1], [], []>} : vector<8x256xbf16>, vector<256x512xbf16>, vector<8x512xf32> -> vector<8x512xf32>
    %c6 = arith.constant 6 : index
    %c0_35 = arith.constant 0 : index
    %75 = vector.load %arg3[%c6, %c0_35] : memref<24x512xf32, #tpu.memory_space<vmem>>, vector<1x512xf32>
    %76 = vector.broadcast %75 : vector<1x512xf32> to vector<8x512xf32>
    %77 = arith.addf %74, %76 : vector<8x512xf32>
    %78 = arith.mulf %77, %77 : vector<8x512xf32>
    %79 = arith.mulf %77, %78 : vector<8x512xf32>
    %cst_36 = arith.constant 4.471500e-02 : f32
    %80 = vector.broadcast %cst_36 : f32 to vector<8x512xf32>
    %81 = arith.mulf %80, %79 : vector<8x512xf32>
    %82 = arith.addf %77, %81 : vector<8x512xf32>
    %cst_37 = arith.constant 0.797884583 : f32
    %83 = vector.broadcast %cst_37 : f32 to vector<8x512xf32>
    %84 = arith.mulf %83, %82 : vector<8x512xf32>
    %85 = math.tanh %84 : vector<8x512xf32>
    %cst_38 = arith.constant 1.000000e+00 : f32
    %86 = vector.broadcast %cst_38 : f32 to vector<8x512xf32>
    %87 = arith.addf %86, %85 : vector<8x512xf32>
    %cst_39 = arith.constant 5.000000e-01 : f32
    %88 = vector.broadcast %cst_39 : f32 to vector<8x512xf32>
    %89 = arith.mulf %88, %87 : vector<8x512xf32>
    %90 = arith.mulf %77, %89 : vector<8x512xf32>
    %91 = arith.truncf %90 : vector<8x512xf32> to vector<8x512xbf16>
    %cst_40 = arith.constant dense<0.000000e+00> : vector<8x256xf32>
    %92 = tpu.matmul %91, %40, %cst_40 {dimension_numbers = #tpu.dot_dimension_numbers<[1], [0], [0], [1], [0, 0, 1, 1], [], []>} : vector<8x512xbf16>, vector<512x256xbf16>, vector<8x256xf32> -> vector<8x256xf32>
    %c7 = arith.constant 7 : index
    %c0_41 = arith.constant 0 : index
    %93 = vector.load %arg3[%c7, %c0_41] : memref<24x512xf32, #tpu.memory_space<vmem>>, vector<1x256xf32>
    %94 = vector.broadcast %93 : vector<1x256xf32> to vector<8x256xf32>
    %95 = arith.addf %92, %94 : vector<8x256xf32>
    %96 = arith.addf %72, %95 : vector<8x256xf32>
    %c8 = arith.constant 8 : index
    %c0_42 = arith.constant 0 : index
    %97 = vector.load %arg3[%c8, %c0_42] : memref<24x512xf32, #tpu.memory_space<vmem>>, vector<1x256xf32>
    %c9 = arith.constant 9 : index
    %c0_43 = arith.constant 0 : index
    %98 = vector.load %arg3[%c9, %c0_43] : memref<24x512xf32, #tpu.memory_space<vmem>>, vector<1x256xf32>
    %cst_44 = arith.constant dense<0.000000e+00> : vector<8xf32>
    %99 = vector.multi_reduction <add>, %96, %cst_44 [1] : vector<8x256xf32> to vector<8xf32>
    %100 = vector.shape_cast %99 : vector<8xf32> to vector<8x1xf32>
    %cst_45 = arith.constant 2.560000e+02 : f32
    %101 = vector.broadcast %cst_45 : f32 to vector<8x1xf32>
    %102 = arith.divf %100, %101 : vector<8x1xf32>
    %103 = vector.broadcast %102 : vector<8x1xf32> to vector<8x256xf32>
    %104 = arith.subf %96, %103 : vector<8x256xf32>
    %105 = arith.mulf %104, %104 : vector<8x256xf32>
    %cst_46 = arith.constant dense<0.000000e+00> : vector<8xf32>
    %106 = vector.multi_reduction <add>, %105, %cst_46 [1] : vector<8x256xf32> to vector<8xf32>
    %107 = vector.shape_cast %106 : vector<8xf32> to vector<8x1xf32>
    %cst_47 = arith.constant 2.560000e+02 : f32
    %108 = vector.broadcast %cst_47 : f32 to vector<8x1xf32>
    %109 = arith.divf %107, %108 : vector<8x1xf32>
    %110 = vector.broadcast %102 : vector<8x1xf32> to vector<8x256xf32>
    %111 = arith.subf %96, %110 : vector<8x256xf32>
    %cst_48 = arith.constant 9.99999974E-6 : f32
    %112 = vector.broadcast %cst_48 : f32 to vector<8x1xf32>
    %113 = arith.addf %109, %112 : vector<8x1xf32>
    %114 = math.rsqrt %113 : vector<8x1xf32>
    %115 = vector.broadcast %114 : vector<8x1xf32> to vector<8x256xf32>
    %116 = arith.mulf %111, %115 : vector<8x256xf32>
    %117 = vector.broadcast %97 : vector<1x256xf32> to vector<8x256xf32>
    %118 = arith.mulf %116, %117 : vector<8x256xf32>
    %119 = vector.broadcast %98 : vector<1x256xf32> to vector<8x256xf32>
    %120 = arith.addf %118, %119 : vector<8x256xf32>
    %c1_49 = arith.constant 1 : index
    %c0_50 = arith.constant 0 : index
    %c0_51 = arith.constant 0 : index
    %121 = vector.load %arg5[%c1_49, %c0_50, %c0_51] : memref<2x768x256xbf16, #tpu.memory_space<vmem>>, vector<1x256x256xbf16>
    %122 = vector.shape_cast %121 : vector<1x256x256xbf16> to vector<256x256xbf16>
    %c1_52 = arith.constant 1 : index
    %c256_53 = arith.constant 256 : index
    %c0_54 = arith.constant 0 : index
    %123 = vector.load %arg5[%c1_52, %c256_53, %c0_54] : memref<2x768x256xbf16, #tpu.memory_space<vmem>>, vector<1x512x256xbf16>
    %124 = vector.shape_cast %123 : vector<1x512x256xbf16> to vector<512x256xbf16>
    %c1_55 = arith.constant 1 : index
    %c0_56 = arith.constant 0 : index
    %c0_57 = arith.constant 0 : index
    %125 = vector.load %arg6[%c1_55, %c0_56, %c0_57] : memref<2x256x512xbf16, #tpu.memory_space<vmem>>, vector<1x256x512xbf16>
    %126 = vector.shape_cast %125 : vector<1x256x512xbf16> to vector<256x512xbf16>
    %127 = arith.truncf %120 : vector<8x256xf32> to vector<8x256xbf16>
    %cst_58 = arith.constant dense<0.000000e+00> : vector<8x256xf32>
    %128 = tpu.matmul %127, %122, %cst_58 {dimension_numbers = #tpu.dot_dimension_numbers<[1], [0], [0], [1], [0, 0, 1, 1], [], []>} : vector<8x256xbf16>, vector<256x256xbf16>, vector<8x256xf32> -> vector<8x256xf32>
    %c10 = arith.constant 10 : index
    %c0_59 = arith.constant 0 : index
    %129 = vector.load %arg3[%c10, %c0_59] : memref<24x512xf32, #tpu.memory_space<vmem>>, vector<1x256xf32>
    %130 = vector.broadcast %129 : vector<1x256xf32> to vector<8x256xf32>
    %131 = arith.addf %128, %130 : vector<8x256xf32>
    %132 = arith.addf %120, %131 : vector<8x256xf32>
    %c11 = arith.constant 11 : index
    %c0_60 = arith.constant 0 : index
    %133 = vector.load %arg3[%c11, %c0_60] : memref<24x512xf32, #tpu.memory_space<vmem>>, vector<1x256xf32>
    %c12 = arith.constant 12 : index
    %c0_61 = arith.constant 0 : index
    %134 = vector.load %arg3[%c12, %c0_61] : memref<24x512xf32, #tpu.memory_space<vmem>>, vector<1x256xf32>
    %cst_62 = arith.constant dense<0.000000e+00> : vector<8xf32>
    %135 = vector.multi_reduction <add>, %132, %cst_62 [1] : vector<8x256xf32> to vector<8xf32>
    %136 = vector.shape_cast %135 : vector<8xf32> to vector<8x1xf32>
    %cst_63 = arith.constant 2.560000e+02 : f32
    %137 = vector.broadcast %cst_63 : f32 to vector<8x1xf32>
    %138 = arith.divf %136, %137 : vector<8x1xf32>
    %139 = vector.broadcast %138 : vector<8x1xf32> to vector<8x256xf32>
    %140 = arith.subf %132, %139 : vector<8x256xf32>
    %141 = arith.mulf %140, %140 : vector<8x256xf32>
    %cst_64 = arith.constant dense<0.000000e+00> : vector<8xf32>
    %142 = vector.multi_reduction <add>, %141, %cst_64 [1] : vector<8x256xf32> to vector<8xf32>
    %143 = vector.shape_cast %142 : vector<8xf32> to vector<8x1xf32>
    %cst_65 = arith.constant 2.560000e+02 : f32
    %144 = vector.broadcast %cst_65 : f32 to vector<8x1xf32>
    %145 = arith.divf %143, %144 : vector<8x1xf32>
    %146 = vector.broadcast %138 : vector<8x1xf32> to vector<8x256xf32>
    %147 = arith.subf %132, %146 : vector<8x256xf32>
    %cst_66 = arith.constant 9.99999974E-6 : f32
    %148 = vector.broadcast %cst_66 : f32 to vector<8x1xf32>
    %149 = arith.addf %145, %148 : vector<8x1xf32>
    %150 = math.rsqrt %149 : vector<8x1xf32>
    %151 = vector.broadcast %150 : vector<8x1xf32> to vector<8x256xf32>
    %152 = arith.mulf %147, %151 : vector<8x256xf32>
    %153 = vector.broadcast %133 : vector<1x256xf32> to vector<8x256xf32>
    %154 = arith.mulf %152, %153 : vector<8x256xf32>
    %155 = vector.broadcast %134 : vector<1x256xf32> to vector<8x256xf32>
    %156 = arith.addf %154, %155 : vector<8x256xf32>
    %157 = arith.truncf %156 : vector<8x256xf32> to vector<8x256xbf16>
    %cst_67 = arith.constant dense<0.000000e+00> : vector<8x512xf32>
    %158 = tpu.matmul %157, %126, %cst_67 {dimension_numbers = #tpu.dot_dimension_numbers<[1], [0], [0], [1], [0, 0, 1, 1], [], []>} : vector<8x256xbf16>, vector<256x512xbf16>, vector<8x512xf32> -> vector<8x512xf32>
    %c13 = arith.constant 13 : index
    %c0_68 = arith.constant 0 : index
    %159 = vector.load %arg3[%c13, %c0_68] : memref<24x512xf32, #tpu.memory_space<vmem>>, vector<1x512xf32>
    %160 = vector.broadcast %159 : vector<1x512xf32> to vector<8x512xf32>
    %161 = arith.addf %158, %160 : vector<8x512xf32>
    %162 = arith.mulf %161, %161 : vector<8x512xf32>
    %163 = arith.mulf %161, %162 : vector<8x512xf32>
    %cst_69 = arith.constant 4.471500e-02 : f32
    %164 = vector.broadcast %cst_69 : f32 to vector<8x512xf32>
    %165 = arith.mulf %164, %163 : vector<8x512xf32>
    %166 = arith.addf %161, %165 : vector<8x512xf32>
    %cst_70 = arith.constant 0.797884583 : f32
    %167 = vector.broadcast %cst_70 : f32 to vector<8x512xf32>
    %168 = arith.mulf %167, %166 : vector<8x512xf32>
    %169 = math.tanh %168 : vector<8x512xf32>
    %cst_71 = arith.constant 1.000000e+00 : f32
    %170 = vector.broadcast %cst_71 : f32 to vector<8x512xf32>
    %171 = arith.addf %170, %169 : vector<8x512xf32>
    %cst_72 = arith.constant 5.000000e-01 : f32
    %172 = vector.broadcast %cst_72 : f32 to vector<8x512xf32>
    %173 = arith.mulf %172, %171 : vector<8x512xf32>
    %174 = arith.mulf %161, %173 : vector<8x512xf32>
    %175 = arith.truncf %174 : vector<8x512xf32> to vector<8x512xbf16>
    %cst_73 = arith.constant dense<0.000000e+00> : vector<8x256xf32>
    %176 = tpu.matmul %175, %124, %cst_73 {dimension_numbers = #tpu.dot_dimension_numbers<[1], [0], [0], [1], [0, 0, 1, 1], [], []>} : vector<8x512xbf16>, vector<512x256xbf16>, vector<8x256xf32> -> vector<8x256xf32>
    %c14 = arith.constant 14 : index
    %c0_74 = arith.constant 0 : index
    %177 = vector.load %arg3[%c14, %c0_74] : memref<24x512xf32, #tpu.memory_space<vmem>>, vector<1x256xf32>
    %178 = vector.broadcast %177 : vector<1x256xf32> to vector<8x256xf32>
    %179 = arith.addf %176, %178 : vector<8x256xf32>
    %180 = arith.addf %156, %179 : vector<8x256xf32>
    %cst_75 = arith.constant dense<0.000000e+00> : vector<8xf32>
    %181 = vector.multi_reduction <add>, %180, %cst_75 [1] : vector<8x256xf32> to vector<8xf32>
    %182 = vector.shape_cast %181 : vector<8xf32> to vector<8x1xf32>
    %cst_76 = arith.constant 2.560000e+02 : f32
    %183 = vector.broadcast %cst_76 : f32 to vector<8x1xf32>
    %184 = arith.divf %182, %183 : vector<8x1xf32>
    %185 = vector.broadcast %184 : vector<8x1xf32> to vector<8x256xf32>
    %186 = arith.subf %180, %185 : vector<8x256xf32>
    %187 = arith.mulf %186, %186 : vector<8x256xf32>
    %cst_77 = arith.constant dense<0.000000e+00> : vector<8xf32>
    %188 = vector.multi_reduction <add>, %187, %cst_77 [1] : vector<8x256xf32> to vector<8xf32>
    %189 = vector.shape_cast %188 : vector<8xf32> to vector<8x1xf32>
    %cst_78 = arith.constant 2.560000e+02 : f32
    %190 = vector.broadcast %cst_78 : f32 to vector<8x1xf32>
    %191 = arith.divf %189, %190 : vector<8x1xf32>
    %192 = vector.broadcast %184 : vector<8x1xf32> to vector<8x256xf32>
    %193 = arith.subf %180, %192 : vector<8x256xf32>
    %cst_79 = arith.constant 9.99999974E-6 : f32
    %194 = vector.broadcast %cst_79 : f32 to vector<8x1xf32>
    %195 = arith.addf %191, %194 : vector<8x1xf32>
    %196 = math.rsqrt %195 : vector<8x1xf32>
    %197 = vector.broadcast %196 : vector<8x1xf32> to vector<8x256xf32>
    %198 = arith.mulf %193, %197 : vector<8x256xf32>
    %199 = arith.truncf %198 : vector<8x256xf32> to vector<8x256xbf16>
    %cst_80 = arith.constant dense<0.000000e+00> : vector<8x128xf32>
    %200 = tpu.matmul %199, %3, %cst_80 {dimension_numbers = #tpu.dot_dimension_numbers<[1], [0], [0], [1], [0, 0, 1, 1], [], []>} : vector<8x256xbf16>, vector<256x128xbf16>, vector<8x128xf32> -> vector<8x128xf32>
    %c17 = arith.constant 17 : index
    %c0_81 = arith.constant 0 : index
    %201 = vector.load %arg3[%c17, %c0_81] : memref<24x512xf32, #tpu.memory_space<vmem>>, vector<1x128xf32>
    %202 = vector.broadcast %201 : vector<1x128xf32> to vector<8x128xf32>
    %203 = arith.addf %200, %202 : vector<8x128xf32>
    %cst_82 = arith.constant 0.000000e+00 : f32
    %204 = vector.broadcast %cst_82 : f32 to vector<8x128xf32>
    %205 = arith.maximumf %203, %204 : vector<8x128xf32>
    %cst_83 = arith.constant dense<0.000000e+00> : vector<8xf32>
    %206 = vector.multi_reduction <add>, %205, %cst_83 [1] : vector<8x128xf32> to vector<8xf32>
    %207 = vector.shape_cast %206 : vector<8xf32> to vector<8x1xf32>
    %cst_84 = arith.constant 1.280000e+02 : f32
    %208 = vector.broadcast %cst_84 : f32 to vector<8x1xf32>
    %209 = arith.divf %207, %208 : vector<8x1xf32>
    %210 = vector.broadcast %209 : vector<8x1xf32> to vector<8x128xf32>
    %211 = arith.subf %205, %210 : vector<8x128xf32>
    %212 = arith.mulf %211, %211 : vector<8x128xf32>
    %cst_85 = arith.constant dense<0.000000e+00> : vector<8xf32>
    %213 = vector.multi_reduction <add>, %212, %cst_85 [1] : vector<8x128xf32> to vector<8xf32>
    %214 = vector.shape_cast %213 : vector<8xf32> to vector<8x1xf32>
    %cst_86 = arith.constant 1.280000e+02 : f32
    %215 = vector.broadcast %cst_86 : f32 to vector<8x1xf32>
    %216 = arith.divf %214, %215 : vector<8x1xf32>
    %217 = vector.broadcast %209 : vector<8x1xf32> to vector<8x128xf32>
    %218 = arith.subf %205, %217 : vector<8x128xf32>
    %cst_87 = arith.constant 9.99999974E-6 : f32
    %219 = vector.broadcast %cst_87 : f32 to vector<8x1xf32>
    %220 = arith.addf %216, %219 : vector<8x1xf32>
    %221 = math.rsqrt %220 : vector<8x1xf32>
    %222 = vector.broadcast %221 : vector<8x1xf32> to vector<8x128xf32>
    %223 = arith.mulf %218, %222 : vector<8x128xf32>
    %224 = arith.truncf %223 : vector<8x128xf32> to vector<8x128xbf16>
    %cst_88 = arith.constant dense<0.000000e+00> : vector<8x128xf32>
    %225 = tpu.matmul %224, %4, %cst_88 {dimension_numbers = #tpu.dot_dimension_numbers<[1], [0], [0], [1], [0, 0, 1, 1], [], []>} : vector<8x128xbf16>, vector<128x128xbf16>, vector<8x128xf32> -> vector<8x128xf32>
    %c18 = arith.constant 18 : index
    %c0_89 = arith.constant 0 : index
    %226 = vector.load %arg3[%c18, %c0_89] : memref<24x512xf32, #tpu.memory_space<vmem>>, vector<1x128xf32>
    %227 = vector.broadcast %226 : vector<1x128xf32> to vector<8x128xf32>
    %228 = arith.addf %225, %227 : vector<8x128xf32>
    %c0_90 = arith.constant 0 : index
    %c0_91 = arith.constant 0 : index
    %229 = vector.load %arg7[%c0_90, %c0_91] : memref<8x128xf32, #tpu.memory_space<vmem>>, vector<8x128xf32>
    tpu.vector_store %arg7[%c0_90, %c0_91], %228 {strides = array<i32>} : memref<8x128xf32, #tpu.memory_space<vmem>>, vector<8x128xf32>,
    return
  }
  func.func @transform_0(%arg0: i32) -> (i32, i32) {
    %c0_i32 = arith.constant 0 : i32
    %c0_i32_0 = arith.constant 0 : i32
    return %arg0, %c0_i32 : i32, i32
  }
  func.func @transform_1(%arg0: i32) -> (i32, i32) {
    %c0_i32 = arith.constant 0 : i32
    %c0_i32_0 = arith.constant 0 : i32
    return %arg0, %c0_i32 : i32, i32
  }
  func.func @transform_2(%arg0: i32) -> (i32, i32) {
    %c0_i32 = arith.constant 0 : i32
    %c0_i32_0 = arith.constant 0 : i32
    %c0_i32_1 = arith.constant 0 : i32
    return %c0_i32, %c0_i32_0 : i32, i32
  }
  func.func @transform_3(%arg0: i32) -> (i32, i32) {
    %c0_i32 = arith.constant 0 : i32
    %c0_i32_0 = arith.constant 0 : i32
    %c0_i32_1 = arith.constant 0 : i32
    return %c0_i32, %c0_i32_0 : i32, i32
  }
  func.func @transform_4(%arg0: i32) -> (i32, i32, i32) {
    %c0_i32 = arith.constant 0 : i32
    %c0_i32_0 = arith.constant 0 : i32
    %c0_i32_1 = arith.constant 0 : i32
    %c0_i32_2 = arith.constant 0 : i32
    return %c0_i32, %c0_i32_0, %c0_i32_1 : i32, i32, i32
  }
  func.func @transform_5(%arg0: i32) -> (i32, i32, i32) {
    %c0_i32 = arith.constant 0 : i32
    %c0_i32_0 = arith.constant 0 : i32
    %c0_i32_1 = arith.constant 0 : i32
    %c0_i32_2 = arith.constant 0 : i32
    return %c0_i32, %c0_i32_0, %c0_i32_1 : i32, i32, i32
  }
  func.func @transform_6(%arg0: i32) -> (i32, i32) {
    %c0_i32 = arith.constant 0 : i32
    %c0_i32_0 = arith.constant 0 : i32
    return %arg0, %c0_i32 : i32, i32
  }
}

</mosaic_0001>

<bundles_post_ra>
// kernel: _predict_jit.1
= control target key start
LH: loop header
LB: loop body
LE: loop exit
PB: predicated region body
PF: predicated region fallthrough
CT: control target
= control target key end

     0   :  { %11 = vsyncpa [#allocation3], 0  ;;  %s4461_s0 = inlined_call_operand.hbm [shape: f32[8,128], index: 0, kind: input, shape index: {}]   ;;  %s4462_s1 = inlined_call_operand.hbm [shape: f32[8,64], index: 1, kind: input, shape index: {}]   ;;  %s4463_s2 = inlined_call_operand.hbm [shape: f32[24,512], index: 2, kind: input, shape index: {}]   ;;  %s4464_s3 = inlined_call_operand.hbm [shape: bf16[448,128], index: 3, kind: input, shape index: {}]   ;;  %s4465_s4 = inlined_call_operand.hbm [shape: bf16[2,768,256], index: 4, kind: input, shape index: {}]   ;;  %s4466_s5 = inlined_call_operand.hbm [shape: bf16[2,256,512], index: 5, kind: input, shape index: {}]   ;;  %s4467_s6 = inlined_call_operand.vmem [shape: f32[8,128], index: 6, kind: output, shape index: {}]  }
   0x1   :  { %12 = vsyncpa [#allocation5], 0 }
   0x2   :  { %13 = vsyncpa [#allocation8], 0 }
   0x3   :  { %14 = vsyncpa [#allocation11], 0  ;;  %s4275_s21 = smov [#allocation4]   ;;  %s4276_s23 = smov [#allocation7]  }
   0x4   :  { %s31_s22 = sshll.u32 %s4275_s21, 4  ;;  %s52_s24 = sshll.u32 %s4276_s23, 4  ;;  %s32_s22 = int_to_ptr.vmem [resolvable:$true] %s31_s22  ;;  %s53_s24 = int_to_ptr.vmem [resolvable:$true] %s52_s24 }
   0x5   :  { %s4155_s25 = scalar_lea.vmem %s32_s22, 128  ;;  %p4160_p1 = scmp.lt.s32.totalorder %s32_s22, %s32_s22 }
   0x6   :  { %p4156_p0 = scmp.ne.s32.totalorder %s32_s22, %s4155_s25  ;;  %p4161_p2 = scmp.lt.s32.totalorder %s4155_s25, %s4155_s25 }
   0x8   :  { %p4162_p3 = por %p4161_p2, %p4160_p1 }
   0xa   :  { %p4163_p4 = pnand %p4162_p3, %p4156_p0 }
   0xc   :  { %4166 = shalt.err (!%p4163_p4)
}
   0xd   :  { %34 = dma.hbm_to_vmem [thread:$0]  %s4462_s1, 128, %s32_s22, [#allocation5]  }
   0xe   :  { %s4175_s28 = scalar_lea.vmem %s53_s24, 3584  ;;  %p4180_p6 = scmp.lt.s32.totalorder %s53_s24, %s53_s24 }
   0xf   :  { %p4176_p5 = scmp.ne.s32.totalorder %s53_s24, %s4175_s28  ;;  %p4181_p7 = scmp.lt.s32.totalorder %s4175_s28, %s4175_s28 }
  0x11   :  { %p4182_p8 = por %p4181_p7, %p4180_p6 }
  0x13   :  { %p4183_p9 = pnand %p4182_p8, %p4176_p5 }
  0x15   :  { %4186 = shalt.err (!%p4183_p9)
}
  0x16   :  { %s4277_s29 = smov 64   ;;  %s4278_s30 = smov 4  }
  0x17   :  { %58 = dma.hbm_to_vmem [thread:$0]  %s4464_s3, 3584, %s53_s24, [#allocation8], %s4277_s29, %s4277_s29, %s4278_s30  }
  0x18   :  { %s4279_s9 = smov [#allocation2]   ;;  %s4280_s11 = smov [#allocation6]  }
  0x19   :  { %s21_s10 = sshll.u32 %s4279_s9, 4  ;;  %s40_s12 = sshll.u32 %s4280_s11, 4  ;;  %s22_s10 = int_to_ptr.vmem [resolvable:$true] %s21_s10  ;;  %s41_s12 = int_to_ptr.vmem [resolvable:$true] %s40_s12 }
  0x1a   :  { %s4195_s1 = scalar_lea.vmem %s22_s10, 128  ;;  %p4200_p11 = scmp.lt.s32.totalorder %s22_s10, %s22_s10 }
  0x1b   :  { %p4196_p10 = scmp.ne.s32.totalorder %s22_s10, %s4195_s1  ;;  %p4201_p12 = scmp.lt.s32.totalorder %s4195_s1, %s4195_s1 }
  0x1d   :  { %p4202_p13 = por %p4201_p12, %p4200_p11 }
  0x1f   :  { %p4203_p0 = pnand %p4202_p13, %p4196_p10 }
  0x21   :  { %4206 = shalt.err (!%p4203_p0)
}
  0x22   :  { %24 = dma.hbm_to_vmem [thread:$0]  %s4461_s0, 128, %s22_s10, [#allocation3]  }
  0x23   :  { %s4215_s15 = scalar_lea.vmem %s41_s12, 1536  ;;  %p4220_p2 = scmp.lt.s32.totalorder %s41_s12, %s41_s12 }
  0x24   :  { %p4216_p1 = scmp.ne.s32.totalorder %s41_s12, %s4215_s15  ;;  %p4221_p3 = scmp.lt.s32.totalorder %s4215_s15, %s4215_s15 }
  0x26   :  { %p4222_p4 = por %p4221_p3, %p4220_p2 }
  0x28   :  { %p4223_p5 = pnand %p4222_p4, %p4216_p1 }
  0x2a   :  { %4226 = shalt.err (!%p4223_p5)
}
  0x2b   :  { %s4281_s3 = smov 512   ;;  %s4282_s16 = smov 32  }
  0x2c   :  { %46 = dma.hbm_to_vmem [thread:$0]  %s4463_s2, 1536, %s41_s12, [#allocation5], %s4281_s3, %s4281_s3, %s4282_s16  }
  0x2d   :  { %s4283_s19 = smov [#allocation9]  }
  0x2e   :  { %s64_s20 = sshll.u32 %s4283_s19, 4  ;;  %s65_s20 = int_to_ptr.vmem [resolvable:$true] %s64_s20 }
  0x2f   :  { %s4235_s21 = scalar_lea.vmem %s65_s20, 24576  ;;  %p4240_p7 = scmp.lt.s32.totalorder %s65_s20, %s65_s20 }
  0x30   :  { %p4236_p6 = scmp.ne.s32.totalorder %s65_s20, %s4235_s21  ;;  %p4241_p8 = scmp.lt.s32.totalorder %s4235_s21, %s4235_s21 }
  0x32   :  { %p4242_p9 = por %p4241_p8, %p4240_p7 }
  0x34   :  { %p4243_p10 = pnand %p4242_p9, %p4236_p6 }
  0x36   :  { %4246 = shalt.err (!%p4243_p10)
}
  0x37   :  { %s4284_s0 = smov 128   ;;  %s4285_s22 = smov 8  }
  0x38   :  { %70 = dma.hbm_to_vmem [thread:$0]  %s4465_s4, 24576, %s65_s20, [#allocation8], %s4284_s0, %s4284_s0, %s4285_s22  }
  0x39   :  { %s4286_s25 = smov [#allocation10]  }
  0x3a   :  { %s76_s26 = sshll.u32 %s4286_s25, 4  ;;  %s77_s26 = int_to_ptr.vmem [resolvable:$true] %s76_s26 }
  0x3b   :  { %s4255_s2 = scalar_lea.vmem %s77_s26, 16384  ;;  %p4260_p12 = scmp.lt.s32.totalorder %s77_s26, %s77_s26 }
  0x3c   :  { %p4256_p11 = scmp.ne.s32.totalorder %s77_s26, %s4255_s2  ;;  %p4261_p13 = scmp.lt.s32.totalorder %s4255_s2, %s4255_s2 }
  0x3e   :  { %p4262_p0 = por %p4261_p13, %p4260_p12 }
  0x40   :  { %p4263_p1 = pnand %p4262_p0, %p4256_p11 }
  0x42   :  { %4266 = shalt.err (!%p4263_p1)
}
  0x43   :  { %s4287_s27 = smov 256   ;;  %s4288_s28 = smov 16  }
  0x44   :  { %82 = dma.hbm_to_vmem [thread:$0]  %s4466_s5, 16384, %s77_s26, [#allocation11], %s4287_s27, %s4287_s27, %s4288_s28  }
  0x45   :  { %4267 = dma.done.wait [#allocation3], 128  }
  0x46   :  { %4268 = vsyncadd [#allocation3], 4294967168 }
  0x47   :  { %4269 = dma.done.wait [#allocation5], 1664  }
  0x48   :  { %4270 = vsyncadd [#allocation5], 4294965632 }
  0x49   :  { %4271 = dma.done.wait [#allocation8], 28160  }
  0x4a   :  { %4272 = vsyncadd [#allocation8], 4294939136 }
  0x4b   :  { %4273 = dma.done.wait [#allocation11], 16384  }
  0x4c   :  { %4274 = vsyncadd [#allocation11], 4294950912  ;;  %v4289_v0 = vmov 0.0   ;;  %vm4290_vm0 = vmmov 0   ;;  %v3611_v1 = vld [vmem:[#allocation7 + $0x18] sm:$0xff]   ;;  %v3612_v2 = vld [vmem:[#allocation7 + $0x10] sm:$0xff]   ;;  %v412_v62 = vlaneseq }
  0x4d   :  { %3563 = vmatprep.subr.bf16.mxu0 %v4289_v0  ;;  %3571 = vmatprep.mubr.msk.bf16.mxu0 %vm4290_vm0, %v4289_v0  ;;  %v3613_v3 = vld [vmem:[#allocation7 + $0x8] sm:$0xff]   ;;  %v3614_v4 = vld [vmem:[#allocation7] sm:$0xff]   ;;  %v103_v5 = vld [vmem:[#allocation4] sm:$0xff]  ;;  %vm186_vm1 = vcmask 523264  }
  0x4e   :  { %3564 = vmatpush3.bf16.msra.mxu0 %v3611_v1  ;;  %v160_v6 = vpack.c.bf16 %v103_v5, %v103_v5  ;;  %v161_v7 = vld [vmem:[#allocation6] ss:$0 sm:$0xff]  ;;  %v3615_v14 = vld [vmem:[#allocation9 + $0x74] ss:$8 sps:$4 sm:$0xff]   ;;  %v3617_v15 = vld [vmem:[#allocation9 + $0x70] ss:$8 sps:$4 sm:$0xff]  }
  0x4f   :  { %3565 = vmatprep.subr.bf16.mxu0 %v4289_v0  ;;  %v3618_v16 = vld [vmem:[#allocation9 + $0x64] ss:$8 sps:$4 sm:$0xff]   ;;  %582 = vmatprep.subr.bf16.mxu1 %v3615_v14  ;;  %v3620_v17 = vld [vmem:[#allocation9 + $0x60] ss:$8 sps:$4 sm:$0xff]   ;;  %v3621_v18 = vld [vmem:[#allocation9 + $0x54] ss:$8 sps:$4 sm:$0xff]  }
  0x50   :  { %583 = vmatpush1.bf16.msra.mxu1 %v3617_v15  ;;  %v3623_v19 = vld [vmem:[#allocation9 + $0x50] ss:$8 sps:$4 sm:$0xff]   ;;  %v3624_v20 = vld [vmem:[#allocation9 + $0x44] ss:$8 sps:$4 sm:$0xff]   ;;  %v3626_v21 = vld [vmem:[#allocation9 + $0x40] ss:$8 sps:$4 sm:$0xff]  }
  0x51   :  { %584 = vmatprep.subr.bf16.mxu1 %v3618_v16  ;;  %v3627_v22 = vld [vmem:[#allocation9 + $0x34] ss:$8 sps:$4 sm:$0xff]   ;;  %v3629_v23 = vld [vmem:[#allocation9 + $0x30] ss:$8 sps:$4 sm:$0xff]   ;;  %v3630_v24 = vld [vmem:[#allocation9 + $0x24] ss:$8 sps:$4 sm:$0xff]  }
  0x52   :  { %3566 = vmatpush3.bf16.msra.mxu0 %v3612_v2  ;;  %v3632_v25 = vld [vmem:[#allocation9 + $0x20] ss:$8 sps:$4 sm:$0xff]   ;;  %v3633_v26 = vld [vmem:[#allocation9 + $0x14] ss:$8 sps:$4 sm:$0xff]   ;;  %v3635_v27 = vld [vmem:[#allocation9 + $0x10] ss:$8 sps:$4 sm:$0xff]  }
  0x53   :  { %3567 = vmatprep.subr.bf16.mxu0 %v4289_v0  ;;  %v3636_v28 = vld [vmem:[#allocation9 + $0x4] ss:$8 sps:$4 sm:$0xff]   ;;  %v3638_v29 = vld [vmem:[#allocation9] ss:$8 sps:$4 sm:$0xff]   ;;  %v3639_v30 = vld [vmem:[#allocation9 + $0xf4] ss:$8 sps:$4 sm:$0xff]  }
  0x54   :  { %585 = vmatpush1.bf16.msra.mxu1 %v3620_v17  ;;  %v3641_v31 = vld [vmem:[#allocation9 + $0xf0] ss:$8 sps:$4 sm:$0xff]   ;;  %v3642_v32 = vld [vmem:[#allocation9 + $0xe4] ss:$8 sps:$4 sm:$0xff]   ;;  %v3644_v37 = vld [vmem:[#allocation9 + $0xe0] ss:$8 sps:$4 sm:$0xff]  }
  0x55   :  { %586 = vmatprep.subr.bf16.mxu1 %v3621_v18  ;;  %v3645_v38 = vld [vmem:[#allocation9 + $0xd4] ss:$8 sps:$4 sm:$0xff]   ;;  %v3647_v39 = vld [vmem:[#allocation9 + $0xd0] ss:$8 sps:$4 sm:$0xff]   ;;  %v3648_v40 = vld [vmem:[#allocation9 + $0xc4] ss:$8 sps:$4 sm:$0xff]  }
  0x56   :  { %3568 = vmatpush3.bf16.msra.mxu0 %v3613_v3  ;;  %v3650_v41 = vld [vmem:[#allocation9 + $0xc0] ss:$8 sps:$4 sm:$0xff]   ;;  %v3651_v42 = vld [vmem:[#allocation9 + $0xb4] ss:$8 sps:$4 sm:$0xff]   ;;  %v3653_v43 = vld [vmem:[#allocation9 + $0xb0] ss:$8 sps:$4 sm:$0xff]  }
  0x57   :  { %3569 = vmatprep.subr.bf16.mxu0 %v4289_v0  ;;  %v3654_v44 = vld [vmem:[#allocation9 + $0xa4] ss:$8 sps:$4 sm:$0xff]   ;;  %v3656_v45 = vld [vmem:[#allocation9 + $0xa0] ss:$8 sps:$4 sm:$0xff]   ;;  %v3657_v46 = vld [vmem:[#allocation9 + $0x94] ss:$8 sps:$4 sm:$0xff]  }
  0x58   :  { %587 = vmatpush1.bf16.msra.mxu1 %v3623_v19  ;;  %v3659_v47 = vld [vmem:[#allocation9 + $0x90] ss:$8 sps:$4 sm:$0xff]   ;;  %v3660_v48 = vld [vmem:[#allocation9 + $0x84] ss:$8 sps:$4 sm:$0xff]   ;;  %v3662_v49 = vld [vmem:[#allocation9 + $0x80] ss:$8 sps:$4 sm:$0xff]  }
  0x59   :  { %588 = vmatprep.subr.bf16.mxu1 %v3624_v20  ;;  %v231_v54 = vld [vmem:[#allocation6 + $0x1] ss:$0 sm:$0xff]  ;;  %v232_v56 = vld [vmem:[#allocation6 + $0x2] ss:$0 sm:$0xff]  ;;  %v102_v58 = vld [vmem:[#allocation2] sm:$0xff]  ;;  %v4350_v63 = vshrl.u32 %v412_v62, 7 }
  0x5a   :  { %3570 = vmatpush3.bf16.msra.mxu0 %v3614_v4  ;;  %v407_v60 = vpack.c.bf16 %v102_v58, %v102_v58  ;;  %v410_v2 = vld [vmem:[#allocation6 + $0x3] ss:$8 sm:$0x3]  ;;  %v3665_v16 = vld [vmem:[#allocation10 + $0xe4] ss:$16 sps:$4 sm:$0xff]  }
  0x5b   :  { %v4353_v1 = vsub.s32 0, %v4350_v63  ;;  %v4356_v3 = vsub.s32 1, %v4350_v63  ;;  %v3663_v15 = vld [vmem:[#allocation10 + $0xe0] ss:$16 sps:$4 sm:$0xff]   ;;  %v3666_v17 = vld [vmem:[#allocation10 + $0xe8] ss:$16 sps:$4 sm:$0xff]   ;;  %1017 = vmatprep.subr.bf16.mxu0 %v3665_v16 }
  0x5c   :  { %589 = vmatpush1.bf16.msra.mxu1 %v3626_v21  ;;  %v3668_v18 = vld [vmem:[#allocation10 + $0xec] ss:$16 sps:$4 sm:$0xff]   ;;  %v3671_v19 = vld [vmem:[#allocation10 + $0xc4] ss:$16 sps:$4 sm:$0xff]   ;;  %v3669_v21 = vld [vmem:[#allocation10 + $0xc0] ss:$16 sps:$4 sm:$0xff]  }
  0x5d   :  { %3572 = vmatmul.mubr.msk.bf16.vlgmr.msra.gmra.mxu0 %vm186_vm1, %v160_v6  ;;  %590 = vmatprep.subr.bf16.mxu1 %v3627_v22  ;;  %v415_v4 = vrot.slane %v410_v2, %v4353_v1  ;;  %v419_v5 = vrot.slane %v410_v2, %v4356_v3  ;;  %v3674_v20 = vld [vmem:[#allocation10 + $0xcc] ss:$16 sps:$4 sm:$0xff]   ;;  %v3672_v22 = vld [vmem:[#allocation10 + $0xc8] ss:$16 sps:$4 sm:$0xff]   ;;  %v3725_v62 = vld [vmem:[#allocation10 + $0x1a4] ss:$16 sps:$4 sm:$0xff]  }
  0x5e   :  { %1018 = vmatpush1.bf16.msra.mxu0 %v3663_v15  ;;  %v3728_v2 = vld [vmem:[#allocation10 + $0x1ac] ss:$16 sps:$4 sm:$0xff]   ;;  %v3741_v16 = vld [vmem:[#allocation10 + $0x140] ss:$16 sps:$4 sm:$0xff]  }
  0x5f   :  { %1019 = vmatprep.subr.bf16.mxu0 %v3671_v19  ;;  %v3746_v15 = vld [vmem:[#allocation10 + $0x14c] ss:$16 sps:$4 sm:$0xff]  }
  0x60   :  { %591 = vmatpush1.bf16.msra.mxu1 %v3629_v23  ;;  %v3677_v23 = vld [vmem:[#allocation10 + $0xa4] ss:$16 sps:$4 sm:$0xff]   ;;  %v3752_v19 = vld [vmem:[#allocation10 + $0x12c] ss:$16 sps:$4 sm:$0xff]  }
  0x61   :  { %592 = vmatprep.subr.bf16.mxu1 %v3630_v24  ;;  %v3680_v24 = vld [vmem:[#allocation10 + $0xac] ss:$16 sps:$4 sm:$0xff]  }
  0x62   :  { %1020 = vmatpush1.bf16.msra.mxu0 %v3669_v21  ;;  %v3750_v21 = vld [vmem:[#allocation10 + $0x128] ss:$16 sps:$4 sm:$0xff]  }
  0x63   :  { %1021 = vmatprep.subr.bf16.mxu0 %v3677_v23  ;;  %v3758_v23 = vld [vmem:[#allocation10 + $0x10c] ss:$16 sps:$4 sm:$0xff]  }
  0x64   :  { %593 = vmatpush1.bf16.msra.mxu1 %v3632_v25  ;;  %v3675_v25 = vld [vmem:[#allocation10 + $0xa0] ss:$16 sps:$4 sm:$0xff]  }
  0x65   :  { %594 = vmatprep.subr.bf16.mxu1 %v3633_v26  ;;  %v3678_v26 = vld [vmem:[#allocation10 + $0xa8] ss:$16 sps:$4 sm:$0xff]  }
  0x66   :  { %1022 = vmatpush1.bf16.msra.mxu0 %v3675_v25  ;;  %v3756_v25 = vld [vmem:[#allocation10 + $0x108] ss:$16 sps:$4 sm:$0xff]  }
  0x68   :  { %595 = vmatpush1.bf16.msra.mxu1 %v3635_v27  ;;  %v3683_v27 = vld [vmem:[#allocation10 + $0x84] ss:$16 sps:$4 sm:$0xff]  }
  0x69   :  { %596 = vmatprep.subr.bf16.mxu1 %v3636_v28  ;;  %v3686_v28 = vld [vmem:[#allocation10 + $0x8c] ss:$16 sps:$4 sm:$0xff]   ;;  %1023 = vmatprep.subr.bf16.mxu0 %v3683_v27 }
  0x6a   :  { %v3764_v27 = vld [vmem:[#allocation9 + $0x274] ss:$8 sps:$4 sm:$0xff]  }
  0x6c   :  { %597 = vmatpush1.bf16.msra.mxu1 %v3638_v29  ;;  %v3681_v29 = vld [vmem:[#allocation10 + $0x80] ss:$16 sps:$4 sm:$0xff]  }
  0x6d   :  { %598 = vmatprep.subr.bf16.mxu1 %v3639_v30  ;;  %v3684_v30 = vld [vmem:[#allocation10 + $0x88] ss:$16 sps:$4 sm:$0xff]   ;;  %1024 = vmatpush1.bf16.msra.mxu0 %v3681_v29 }
  0x70   :  { %599 = vmatpush2.bf16.msra.mxu1 %v3641_v31  ;;  %v3689_v31 = vld [vmem:[#allocation10 + $0x64] ss:$16 sps:$4 sm:$0xff]  }
  0x71   :  { %600 = vmatprep.subr.bf16.mxu1 %v3642_v32  ;;  %v3692_v32 = vld [vmem:[#allocation10 + $0x6c] ss:$16 sps:$4 sm:$0xff]   ;;  %1025 = vmatprep.subr.bf16.mxu0 %v3689_v31 }
  0x72   :  { %v626_v31 = vld [vmem:[#allocation6 + $0x4] ss:$8 sm:$0x3] }
  0x74   :  { %601 = vmatpush2.bf16.msra.mxu1 %v3644_v37  ;;  %v3693_v37 = vld [vmem:[#allocation10 + $0x40] ss:$16 sps:$4 sm:$0xff]  }
  0x75   :  { %602 = vmatprep.subr.bf16.mxu1 %v3645_v38  ;;  %v3696_v38 = vld [vmem:[#allocation10 + $0x48] ss:$16 sps:$4 sm:$0xff]  }
  0x78   :  { %603 = vmatpush2.bf16.msra.mxu1 %v3647_v39  ;;  %v3701_v39 = vld [vmem:[#allocation10 + $0x24] ss:$16 sps:$4 sm:$0xff]  }
  0x79   :  { %604 = vmatprep.subr.bf16.mxu1 %v3648_v40  ;;  %v3704_v40 = vld [vmem:[#allocation10 + $0x2c] ss:$16 sps:$4 sm:$0xff]  }
  0x7c   :  { %605 = vmatpush2.bf16.msra.mxu1 %v3650_v41  ;;  %v3699_v41 = vld [vmem:[#allocation10 + $0x20] ss:$16 sps:$4 sm:$0xff]  }
  0x7d   :  { %606 = vmatprep.subr.bf16.mxu1 %v3651_v42  ;;  %v3702_v42 = vld [vmem:[#allocation10 + $0x28] ss:$16 sps:$4 sm:$0xff]  }
  0x80   :  { %607 = vmatpush2.bf16.msra.mxu1 %v3653_v43  ;;  %v3707_v43 = vld [vmem:[#allocation10 + $0x4] ss:$16 sps:$4 sm:$0xff]  }
  0x81   :  { %608 = vmatprep.subr.bf16.mxu1 %v3654_v44  ;;  %v3710_v44 = vld [vmem:[#allocation10 + $0xc] ss:$16 sps:$4 sm:$0xff]  }
  0x84   :  { %609 = vmatpush2.bf16.msra.mxu1 %v3656_v45  ;;  %v3705_v45 = vld [vmem:[#allocation10] ss:$16 sps:$4 sm:$0xff]  }
  0x85   :  { %610 = vmatprep.subr.bf16.mxu1 %v3657_v46  ;;  %v3708_v46 = vld [vmem:[#allocation10 + $0x8] ss:$16 sps:$4 sm:$0xff]  }
  0x88   :  { %611 = vmatpush2.bf16.msra.mxu1 %v3659_v47  ;;  %v3713_v47 = vld [vmem:[#allocation10 + $0x1e4] ss:$16 sps:$4 sm:$0xff]  }
  0x89   :  { %612 = vmatprep.subr.bf16.mxu1 %v3660_v48  ;;  %v3716_v48 = vld [vmem:[#allocation10 + $0x1ec] ss:$16 sps:$4 sm:$0xff]  }
  0x8c   :  { %613 = vmatpush2.bf16.msra.mxu1 %v3662_v49  ;;  %v3711_v49 = vld [vmem:[#allocation10 + $0x1e0] ss:$16 sps:$4 sm:$0xff]  }
  0x8d   :  { %1058 = vmatprep.subr.bf16.mxu1 %v3668_v18  ;;  %v3749_v18 = vld [vmem:[#allocation10 + $0x124] ss:$16 sps:$4 sm:$0xff]  }
 0x11d   :  { %v224_v8 = vpop.f32.mrf.mxu0 }
 0x11e   :  { %v225_v9 = vadd.f32 %v224_v8, %v161_v7 }
 0x11f   :  { %v3573_v10 = vpop.f32.mrf.mxu0 }
 0x120   :  { %v230_v11 = vmax.f32 %v225_v9, 0.0 }
 0x121   :  { %v227_v12 = vpop.f32.mrf.mxu0 }
 0x122   :  { %233 = vadd.xlane.f32.xlu0 %v230_v11 }
 0x123   :  { %v3574_v13 = vpop.f32.mrf.mxu0 }
 0x1ab   :  { %v234_v33 = vpop.xlane.xlu0 %233 }
 0x1ac   :  { %v236_v34 = vmul.f32 0.0078125, %v234_v33  ;;  %v3687_v33 = vld [vmem:[#allocation10 + $0x60] ss:$16 sps:$4 sm:$0xff]  }
 0x1ad   :  { %1026 = vmatpush1.bf16.msra.mxu0 %v3687_v33  ;;  %v650_v33 = vrot.slane %v626_v31, %v4353_v1 }
 0x1ae   :  { %v237_v35 = vsub.f32 %v230_v11, %v236_v34  ;;  %v3690_v34 = vld [vmem:[#allocation10 + $0x68] ss:$16 sps:$4 sm:$0xff]  }
 0x1b0   :  { %v238_v36 = vmul.f32 %v237_v35, %v237_v35 }
 0x1b2   :  { %239 = vadd.xlane.f32.xlu0 %v238_v36  ;;  %v3698_v36 = vld [vmem:[#allocation10 + $0x4c] ss:$16 sps:$4 sm:$0xff]  }
 0x23b   :  { %v240_v50 = vpop.xlane.xlu0 %239 }
 0x23c   :  { %v241_v51 = vmul.f32 0.0078125, %v240_v50  ;;  %v3714_v50 = vld [vmem:[#allocation10 + $0x1e8] ss:$16 sps:$4 sm:$0xff]  }
 0x23e   :  { %v242_v52 = vadd.f32 1e-05, %v241_v51  ;;  %v3719_v51 = vld [vmem:[#allocation10 + $0x1c4] ss:$16 sps:$4 sm:$0xff]  }
 0x240   :  { %4119 = vrsqrt.f32 %v242_v52  ;;  %v3722_v52 = vld [vmem:[#allocation10 + $0x1cc] ss:$16 sps:$4 sm:$0xff]  }
 0x24d   :  { %v4120_v53 = vpop.eup %4119 }
 0x24e   :  { %v244_v55 = vmul.f32 %v4120_v53, %v237_v35  ;;  %v3695_v35 = vld [vmem:[#allocation10 + $0x44] ss:$16 sps:$4 sm:$0xff]   ;;  %v3717_v53 = vld [vmem:[#allocation10 + $0x1c0] ss:$16 sps:$4 sm:$0xff]  }
 0x24f   :  { %1027 = vmatprep.subr.bf16.mxu0 %v3695_v35 }
 0x250   :  { %v245_v57 = vmul.f32 %v244_v55, %v231_v54  ;;  %1028 = vmatpush1.bf16.msra.mxu0 %v3693_v37  ;;  %v3720_v54 = vld [vmem:[#allocation10 + $0x1c8] ss:$16 sps:$4 sm:$0xff]  }
 0x251   :  { %1029 = vmatprep.subr.bf16.mxu0 %v3701_v39 }
 0x252   :  { %v246_v59 = vadd.f32 %v245_v57, %v232_v56 }
 0x254   :  { %v408_v61 = vpack.c.bf16 %v246_v59, %v246_v59  ;;  %1030 = vmatpush1.bf16.msra.mxu0 %v3699_v41 }
 0x255   :  { %1031 = vmatprep.subr.bf16.mxu0 %v3707_v43 }
 0x256   :  { %614 = vmatprep.mubr.bf16.mxu1 %v408_v61 }
 0x257   :  { %615 = vmatmul.mubr.bf16.vlgmr.msra.gmra.mxu1 %v407_v60 }
 0x258   :  { %1059 = vmatpush1.bf16.msra.mxu1 %v3666_v17  ;;  %1032 = vmatpush1.bf16.msra.mxu0 %v3705_v45  ;;  %v3744_v17 = vld [vmem:[#allocation10 + $0x148] ss:$16 sps:$4 sm:$0xff]  }
 0x259   :  { %1060 = vmatprep.subr.bf16.mxu1 %v3674_v20  ;;  %1033 = vmatprep.subr.bf16.mxu0 %v3713_v47  ;;  %v3747_v20 = vld [vmem:[#allocation10 + $0x120] ss:$16 sps:$4 sm:$0xff]  }
 0x25a   :  { %v3762_v47 = vld [vmem:[#allocation9 + $0x270] ss:$8 sps:$4 sm:$0xff]  }
 0x25c   :  { %1061 = vmatpush1.bf16.msra.mxu1 %v3672_v22  ;;  %1034 = vmatpush2.bf16.msra.mxu0 %v3711_v49  ;;  %v3755_v22 = vld [vmem:[#allocation10 + $0x104] ss:$16 sps:$4 sm:$0xff]  }
 0x25d   :  { %1062 = vmatprep.subr.bf16.mxu1 %v3680_v24  ;;  %1035 = vmatprep.subr.bf16.mxu0 %v3719_v51  ;;  %v3753_v24 = vld [vmem:[#allocation10 + $0x100] ss:$16 sps:$4 sm:$0xff]   ;;  %v3770_v49 = vld [vmem:[#allocation9 + $0x264] ss:$8 sps:$4 sm:$0xff]  }
 0x25e   :  { %v3768_v51 = vld [vmem:[#allocation9 + $0x260] ss:$8 sps:$4 sm:$0xff]  }
 0x260   :  { %1063 = vmatpush1.bf16.msra.mxu1 %v3678_v26  ;;  %1036 = vmatpush2.bf16.msra.mxu0 %v3717_v53  ;;  %v3761_v26 = vld [vmem:[#allocation9 + $0x174] ss:$8 sps:$4 sm:$0xff]  }
 0x261   :  { %1064 = vmatprep.subr.bf16.mxu1 %v3686_v28  ;;  %1037 = vmatprep.subr.bf16.mxu0 %v3725_v62  ;;  %v3776_v53 = vld [vmem:[#allocation9 + $0x254] ss:$8 sps:$4 sm:$0xff]   ;;  %v3783_v62 = vld [vmem:[#allocation9 + $0x130] ss:$8 sps:$4 sm:$0xff]  }
 0x264   :  { %1065 = vmatpush1.bf16.msra.mxu1 %v3684_v30 }
 0x265   :  { %1066 = vmatprep.subr.bf16.mxu1 %v3692_v32  ;;  %v628_v32 = vld [vmem:[#allocation6 + $0x5] ss:$8 sm:$0x3] }
 0x266   :  { %v663_v37 = vrot.slane %v628_v32, %v4353_v1 }
 0x268   :  { %1067 = vmatpush1.bf16.msra.mxu1 %v3690_v34  ;;  %v654_v34 = vrot.slane %v626_v31, %v4356_v3  ;;  %v3830_v31 = vld [vmem:[#allocation9 + $0x2c4] ss:$8 sps:$4 sm:$0xff]  }
 0x269   :  { %1068 = vmatprep.subr.bf16.mxu1 %v3698_v36 }
 0x26c   :  { %1069 = vmatpush1.bf16.msra.mxu1 %v3696_v38  ;;  %v667_v38 = vrot.slane %v628_v32, %v4356_v3  ;;  %v3833_v32 = vld [vmem:[#allocation9 + $0x1b4] ss:$8 sps:$4 sm:$0xff]  }
 0x26d   :  { %1070 = vmatprep.subr.bf16.mxu1 %v3704_v40 }
 0x270   :  { %1071 = vmatpush1.bf16.msra.mxu1 %v3702_v42 }
 0x271   :  { %1072 = vmatprep.subr.bf16.mxu1 %v3710_v44 }
 0x274   :  { %1073 = vmatpush1.bf16.msra.mxu1 %v3708_v46  ;;  %v3759_v46 = vld [vmem:[#allocation9 + $0x170] ss:$8 sps:$4 sm:$0xff]  }
 0x275   :  { %1074 = vmatprep.subr.bf16.mxu1 %v3716_v48  ;;  %v3767_v48 = vld [vmem:[#allocation9 + $0x164] ss:$8 sps:$4 sm:$0xff]  }
 0x278   :  { %1075 = vmatpush2.bf16.msra.mxu1 %v3714_v50  ;;  %v3765_v50 = vld [vmem:[#allocation9 + $0x160] ss:$8 sps:$4 sm:$0xff]  }
 0x279   :  { %1076 = vmatprep.subr.bf16.mxu1 %v3722_v52  ;;  %v3773_v52 = vld [vmem:[#allocation9 + $0x154] ss:$8 sps:$4 sm:$0xff]  }
 0x27c   :  { %1077 = vmatpush2.bf16.msra.mxu1 %v3720_v54  ;;  %v3771_v54 = vld [vmem:[#allocation9 + $0x150] ss:$8 sps:$4 sm:$0xff]  }
 0x27d   :  { %1078 = vmatprep.subr.bf16.mxu1 %v3728_v2  ;;  %v3786_v2 = vld [vmem:[#allocation9 + $0x230] ss:$8 sps:$4 sm:$0xff]  }
 0x317   :  { %v616_v6 = vpop.f32.mrf.mxu1 }
 0x318   :  { %v617_v7 = vadd.f32 %v616_v6, %v415_v4  ;;  %v3723_v4 = vld [vmem:[#allocation10 + $0x1a0] ss:$16 sps:$4 sm:$0xff]  }
 0x319   :  { %v618_v8 = vpop.f32.mrf.mxu1  ;;  %1038 = vmatpush2.bf16.msra.mxu0 %v3723_v4  ;;  %v3729_v6 = vld [vmem:[#allocation10 + $0x180] ss:$16 sps:$4 sm:$0xff]   ;;  %v3791_v4 = vld [vmem:[#allocation9 + $0x124] ss:$8 sps:$4 sm:$0xff]  }
 0x31a   :  { %v619_v9 = vadd.f32 %v618_v8, %v419_v5  ;;  %v4360_v11 = vadd.f32 %v617_v7, %v102_v58  ;;  %v3726_v5 = vld [vmem:[#allocation10 + $0x1a8] ss:$16 sps:$4 sm:$0xff]   ;;  %v3731_v7 = vld [vmem:[#allocation10 + $0x184] ss:$16 sps:$4 sm:$0xff]  }
 0x31b   :  { %v620_v10 = vpop.f32.mrf.mxu1  ;;  %1079 = vmatpush2.bf16.msra.mxu1 %v3726_v5  ;;  %v3732_v8 = vld [vmem:[#allocation10 + $0x188] ss:$16 sps:$4 sm:$0xff]   ;;  %1039 = vmatprep.subr.bf16.mxu0 %v3731_v7  ;;  %v3794_v5 = vld [vmem:[#allocation9 + $0x224] ss:$8 sps:$4 sm:$0xff]  }
 0x31c   :  { %v4362_v12 = vadd.f32 %v619_v9, %v246_v59  ;;  %v3734_v9 = vld [vmem:[#allocation10 + $0x18c] ss:$16 sps:$4 sm:$0xff]   ;;  %v3737_v10 = vld [vmem:[#allocation10 + $0x164] ss:$16 sps:$4 sm:$0xff]   ;;  %v3792_v7 = vld [vmem:[#allocation9 + $0x220] ss:$8 sps:$4 sm:$0xff]  }
 0x31d   :  { %v621_v13 = vpop.f32.mrf.mxu1  ;;  %1080 = vmatprep.subr.bf16.mxu1 %v3734_v9  ;;  %1040 = vmatpush2.bf16.msra.mxu0 %v3729_v6  ;;  %v3789_v6 = vld [vmem:[#allocation9 + $0x120] ss:$8 sps:$4 sm:$0xff]   ;;  %v3800_v9 = vld [vmem:[#allocation9 + $0x214] ss:$8 sps:$4 sm:$0xff]  }
 0x31e   :  { %v629_v14 = vadd.f32 %v4362_v12, %v4360_v11  ;;  %v3738_v13 = vld [vmem:[#allocation10 + $0x168] ss:$16 sps:$4 sm:$0xff]   ;;  %1041 = vmatprep.subr.bf16.mxu0 %v3737_v10 }
 0x31f   :  { %1081 = vmatpush2.bf16.msra.mxu1 %v3732_v8  ;;  %v3797_v8 = vld [vmem:[#allocation9 + $0x114] ss:$8 sps:$4 sm:$0xff]   ;;  %v3795_v10 = vld [vmem:[#allocation9 + $0x110] ss:$8 sps:$4 sm:$0xff]  }
 0x320   :  { %630 = vadd.xlane.f32.xlu1 %v629_v14  ;;  %v3743_v14 = vld [vmem:[#allocation10 + $0x144] ss:$16 sps:$4 sm:$0xff]  }
 0x3a9   :  { %v631_v55 = vpop.xlane.xlu1 %630 }
 0x3aa   :  { %v633_v56 = vmul.f32 0.00390625, %v631_v55  ;;  %v3774_v55 = vld [vmem:[#allocation9 + $0x250] ss:$8 sps:$4 sm:$0xff]  }
 0x3ac   :  { %v4367_v57 = vsub.f32 %v4360_v11, %v633_v56  ;;  %v4370_v58 = vsub.f32 %v4362_v12, %v633_v56  ;;  %v3740_v11 = vld [vmem:[#allocation10 + $0x16c] ss:$16 sps:$4 sm:$0xff]   ;;  %v3735_v12 = vld [vmem:[#allocation10 + $0x160] ss:$16 sps:$4 sm:$0xff]  }
 0x3ad   :  { %1082 = vmatprep.subr.bf16.mxu1 %v3740_v11  ;;  %1042 = vmatpush2.bf16.msra.mxu0 %v3735_v12  ;;  %v3779_v56 = vld [vmem:[#allocation9 + $0x144] ss:$8 sps:$4 sm:$0xff]   ;;  %v3798_v11 = vld [vmem:[#allocation9 + $0x210] ss:$8 sps:$4 sm:$0xff]  }
 0x3ae   :  { %v636_v59 = vmul.f32 %v4367_v57, %v4367_v57  ;;  %v637_v60 = vmul.f32 %v4370_v58, %v4370_v58  ;;  %1083 = vmatpush2.bf16.msra.mxu1 %v3738_v13  ;;  %1043 = vmatprep.subr.bf16.mxu0 %v3743_v14  ;;  %v3803_v12 = vld [vmem:[#allocation9 + $0x104] ss:$8 sps:$4 sm:$0xff]   ;;  %v3801_v14 = vld [vmem:[#allocation9 + $0x100] ss:$8 sps:$4 sm:$0xff]  }
 0x3af   :  { %1084 = vmatprep.subr.bf16.mxu1 %v3746_v15  ;;  %v3806_v13 = vld [vmem:[#allocation9 + $0x204] ss:$8 sps:$4 sm:$0xff]   ;;  %v3804_v15 = vld [vmem:[#allocation9 + $0x200] ss:$8 sps:$4 sm:$0xff]  }
 0x3b0   :  { %v638_v61 = vadd.f32 %v637_v60, %v636_v59  ;;  %v3780_v59 = vld [vmem:[#allocation9 + $0x240] ss:$8 sps:$4 sm:$0xff]   ;;  %v3785_v60 = vld [vmem:[#allocation9 + $0x134] ss:$8 sps:$4 sm:$0xff]  }
 0x3b1   :  { %1044 = vmatpush2.bf16.msra.mxu0 %v3741_v16  ;;  %v3809_v16 = vld [vmem:[#allocation9 + $0x1f4] ss:$8 sps:$4 sm:$0xff]  }
 0x3b2   :  { %639 = vadd.xlane.f32.xlu1 %v638_v61  ;;  %1085 = vmatpush2.bf16.msra.mxu1 %v3744_v17  ;;  %v3788_v61 = vld [vmem:[#allocation9 + $0x234] ss:$8 sps:$4 sm:$0xff]  }
 0x3b3   :  { %1045 = vmatprep.subr.bf16.mxu0 %v3749_v18  ;;  %1086 = vmatprep.subr.bf16.mxu1 %v3752_v19  ;;  %v3812_v17 = vld [vmem:[#allocation9 + $0x2f4] ss:$8 sps:$4 sm:$0xff]   ;;  %v3807_v18 = vld [vmem:[#allocation9 + $0x1f0] ss:$8 sps:$4 sm:$0xff]  }
 0x3b4   :  { %v3810_v19 = vld [vmem:[#allocation9 + $0x2f0] ss:$8 sps:$4 sm:$0xff]  }
 0x3b5   :  { %1046 = vmatpush2.bf16.msra.mxu0 %v3747_v20  ;;  %v3815_v20 = vld [vmem:[#allocation9 + $0x1e4] ss:$8 sps:$4 sm:$0xff]  }
 0x3b6   :  { %1087 = vmatpush2.bf16.msra.mxu1 %v3750_v21  ;;  %1047 = vmatprep.subr.bf16.mxu0 %v3755_v22  ;;  %v3818_v21 = vld [vmem:[#allocation9 + $0x2e4] ss:$8 sps:$4 sm:$0xff]   ;;  %v3813_v22 = vld [vmem:[#allocation9 + $0x1e0] ss:$8 sps:$4 sm:$0xff]  }
 0x3b7   :  { %1088 = vmatprep.subr.bf16.mxu1 %v3758_v23  ;;  %v3816_v23 = vld [vmem:[#allocation9 + $0x2e0] ss:$8 sps:$4 sm:$0xff]  }
 0x3b9   :  { %1048 = vmatpush2.bf16.msra.mxu0 %v3753_v24  ;;  %v3821_v24 = vld [vmem:[#allocation9 + $0x1d4] ss:$8 sps:$4 sm:$0xff]  }
 0x3ba   :  { %1089 = vmatpush2.bf16.msra.mxu1 %v3756_v25  ;;  %1472 = vmatprep.subr.bf16.mxu0 %v3761_v26  ;;  %v3824_v25 = vld [vmem:[#allocation9 + $0x2d4] ss:$8 sps:$4 sm:$0xff]   ;;  %v3819_v26 = vld [vmem:[#allocation9 + $0x1d0] ss:$8 sps:$4 sm:$0xff]  }
 0x3bb   :  { %1513 = vmatprep.subr.bf16.mxu1 %v3764_v27  ;;  %v3822_v27 = vld [vmem:[#allocation9 + $0x2d0] ss:$8 sps:$4 sm:$0xff]  }
 0x43b   :  { %v640_v28 = vpop.xlane.xlu1 %639 }
 0x43c   :  { %v641_v29 = vmul.f32 0.00390625, %v640_v28  ;;  %v3825_v28 = vld [vmem:[#allocation9 + $0x1c0] ss:$8 sps:$4 sm:$0xff]  }
 0x43e   :  { %v642_v30 = vadd.f32 1e-05, %v641_v29  ;;  %v3827_v29 = vld [vmem:[#allocation9 + $0x1c4] ss:$8 sps:$4 sm:$0xff]  }
 0x440   :  { %4121 = vrsqrt.f32 %v642_v30  ;;  %v3828_v30 = vld [vmem:[#allocation9 + $0x2c0] ss:$8 sps:$4 sm:$0xff]  }
 0x44d   :  { %v4122_v35 = vpop.eup %4121 }
 0x44e   :  { %v645_v36 = vmul.f32 %v4122_v35, %v4370_v58  ;;  %v644_v39 = vmul.f32 %v4122_v35, %v4367_v57  ;;  %v3782_v57 = vld [vmem:[#allocation9 + $0x244] ss:$8 sps:$4 sm:$0xff]   ;;  %v3777_v58 = vld [vmem:[#allocation9 + $0x140] ss:$8 sps:$4 sm:$0xff]   ;;  %v3834_v35 = vld [vmem:[#allocation9 + $0x2b0] ss:$8 sps:$4 sm:$0xff]  }
 0x450   :  { %v658_v40 = vmul.f32 %v654_v34, %v645_v36  ;;  %v657_v41 = vmul.f32 %v650_v33, %v644_v39  ;;  %v3836_v33 = vld [vmem:[#allocation9 + $0x2b4] ss:$8 sps:$4 sm:$0xff]   ;;  %v3831_v34 = vld [vmem:[#allocation9 + $0x1b0] ss:$8 sps:$4 sm:$0xff]   ;;  %v3839_v36 = vld [vmem:[#allocation9 + $0x1a4] ss:$8 sps:$4 sm:$0xff]  }
 0x451   :  { %v3840_v39 = vld [vmem:[#allocation9 + $0x2a0] ss:$8 sps:$4 sm:$0xff]  }
 0x452   :  { %v4382_v42 = vadd.f32 %v667_v38, %v658_v40  ;;  %v4384_v43 = vadd.f32 %v663_v37, %v657_v41  ;;  %v3842_v37 = vld [vmem:[#allocation9 + $0x2a4] ss:$8 sps:$4 sm:$0xff]   ;;  %v3837_v38 = vld [vmem:[#allocation9 + $0x1a0] ss:$8 sps:$4 sm:$0xff]   ;;  %v3845_v40 = vld [vmem:[#allocation9 + $0x194] ss:$8 sps:$4 sm:$0xff]  }
 0x453   :  { %v3848_v41 = vld [vmem:[#allocation9 + $0x294] ss:$8 sps:$4 sm:$0xff]  }
 0x454   :  { %v673_v44 = vpack.c.bf16 %v4382_v42, %v4382_v42  ;;  %v672_v45 = vpack.c.bf16 %v4384_v43, %v4384_v43 }
 0x456   :  { %1049 = vmatprep.mubr.bf16.mxu0 %v673_v44  ;;  %1090 = vmatprep.mubr.bf16.mxu1 %v673_v44  ;;  %v3843_v44 = vld [vmem:[#allocation9 + $0x190] ss:$8 sps:$4 sm:$0xff]  }
 0x457   :  { %1050 = vmatmul.mubr.bf16.vlgmr.msra.gmra.mxu0 %v672_v45  ;;  %1091 = vmatmul.mubr.bf16.vlgmr.msra.gmra.mxu1 %v672_v45  ;;  %v3846_v45 = vld [vmem:[#allocation9 + $0x290] ss:$8 sps:$4 sm:$0xff]  }
 0x458   :  { %1473 = vmatpush1.bf16.msra.mxu0 %v3759_v46  ;;  %1514 = vmatpush1.bf16.msra.mxu1 %v3762_v47  ;;  %v3851_v46 = vld [vmem:[#allocation9 + $0x184] ss:$8 sps:$4 sm:$0xff]  }
 0x459   :  { %1474 = vmatprep.subr.bf16.mxu0 %v3767_v48  ;;  %1515 = vmatprep.subr.bf16.mxu1 %v3770_v49  ;;  %v3854_v47 = vld [vmem:[#allocation9 + $0x284] ss:$8 sps:$4 sm:$0xff]   ;;  %v3849_v48 = vld [vmem:[#allocation9 + $0x180] ss:$8 sps:$4 sm:$0xff]  }
 0x45a   :  { %v3852_v49 = vld [vmem:[#allocation9 + $0x280] ss:$8 sps:$4 sm:$0xff]  }
 0x45c   :  { %1475 = vmatpush1.bf16.msra.mxu0 %v3765_v50  ;;  %1516 = vmatpush1.bf16.msra.mxu1 %v3768_v51  ;;  %v687_v50 = vsub.s32 2, %v4350_v63  ;;  %v675_v51 = vld [vmem:[#allocation6 + $0x6] ss:$8 sm:$0xf] }
 0x45d   :  { %1476 = vmatprep.subr.bf16.mxu0 %v3773_v52  ;;  %1517 = vmatprep.subr.bf16.mxu1 %v3776_v53  ;;  %v691_v52 = vsub.s32 3, %v4350_v63  ;;  %v680_v53 = vrot.slane %v675_v51, %v4353_v1 }
 0x460   :  { %1477 = vmatpush1.bf16.msra.mxu0 %v3771_v54  ;;  %1518 = vmatpush1.bf16.msra.mxu1 %v3774_v55  ;;  %v688_v54 = vrot.slane %v675_v51, %v687_v50  ;;  %v684_v55 = vrot.slane %v675_v51, %v4356_v3 }
 0x461   :  { %1478 = vmatprep.subr.bf16.mxu0 %v3779_v56  ;;  %1519 = vmatprep.subr.bf16.mxu1 %v3782_v57  ;;  %v692_v56 = vrot.slane %v675_v51, %v691_v52 }
 0x464   :  { %1479 = vmatpush1.bf16.msra.mxu0 %v3777_v58  ;;  %1520 = vmatpush1.bf16.msra.mxu1 %v3780_v59 }
 0x465   :  { %1480 = vmatprep.subr.bf16.mxu0 %v3785_v60  ;;  %1521 = vmatprep.subr.bf16.mxu1 %v3788_v61 }
 0x468   :  { %1481 = vmatpush1.bf16.msra.mxu0 %v3783_v62  ;;  %1522 = vmatpush1.bf16.msra.mxu1 %v3786_v2 }
 0x469   :  { %1482 = vmatprep.subr.bf16.mxu0 %v3791_v4  ;;  %1523 = vmatprep.subr.bf16.mxu1 %v3794_v5 }
 0x46c   :  { %1483 = vmatpush1.bf16.msra.mxu0 %v3789_v6  ;;  %1524 = vmatpush1.bf16.msra.mxu1 %v3792_v7 }
 0x46d   :  { %1484 = vmatprep.subr.bf16.mxu0 %v3797_v8  ;;  %1525 = vmatprep.subr.bf16.mxu1 %v3800_v9 }
 0x470   :  { %1485 = vmatpush1.bf16.msra.mxu0 %v3795_v10  ;;  %1526 = vmatpush1.bf16.msra.mxu1 %v3798_v11 }
 0x471   :  { %1486 = vmatprep.subr.bf16.mxu0 %v3803_v12  ;;  %1527 = vmatprep.subr.bf16.mxu1 %v3806_v13 }
 0x474   :  { %1487 = vmatpush1.bf16.msra.mxu0 %v3801_v14  ;;  %1528 = vmatpush1.bf16.msra.mxu1 %v3804_v15 }
 0x475   :  { %1488 = vmatprep.subr.bf16.mxu0 %v3809_v16  ;;  %1529 = vmatprep.subr.bf16.mxu1 %v3812_v17 }
 0x478   :  { %1489 = vmatpush2.bf16.msra.mxu0 %v3807_v18  ;;  %1530 = vmatpush2.bf16.msra.mxu1 %v3810_v19 }
 0x479   :  { %1490 = vmatprep.subr.bf16.mxu0 %v3815_v20  ;;  %1531 = vmatprep.subr.bf16.mxu1 %v3818_v21 }
 0x47c   :  { %1491 = vmatpush2.bf16.msra.mxu0 %v3813_v22  ;;  %1532 = vmatpush2.bf16.msra.mxu1 %v3816_v23 }
 0x47d   :  { %1492 = vmatprep.subr.bf16.mxu0 %v3821_v24  ;;  %1533 = vmatprep.subr.bf16.mxu1 %v3824_v25 }
 0x480   :  { %1493 = vmatpush2.bf16.msra.mxu0 %v3819_v26  ;;  %1534 = vmatpush2.bf16.msra.mxu1 %v3822_v27 }
 0x481   :  { %1494 = vmatprep.subr.bf16.mxu0 %v3827_v29  ;;  %1535 = vmatprep.subr.bf16.mxu1 %v3830_v31 }
 0x484   :  { %1495 = vmatpush2.bf16.msra.mxu0 %v3825_v28  ;;  %1536 = vmatpush2.bf16.msra.mxu1 %v3828_v30 }
 0x485   :  { %1496 = vmatprep.subr.bf16.mxu0 %v3833_v32  ;;  %1537 = vmatprep.subr.bf16.mxu1 %v3836_v33 }
 0x488   :  { %1497 = vmatpush2.bf16.msra.mxu0 %v3831_v34  ;;  %1538 = vmatpush2.bf16.msra.mxu1 %v3834_v35 }
 0x489   :  { %1498 = vmatprep.subr.bf16.mxu0 %v3839_v36  ;;  %1539 = vmatprep.subr.bf16.mxu1 %v3842_v37 }
 0x48c   :  { %1499 = vmatpush2.bf16.msra.mxu0 %v3837_v38  ;;  %1540 = vmatpush2.bf16.msra.mxu1 %v3840_v39 }
 0x48d   :  { %1500 = vmatprep.subr.bf16.mxu0 %v3845_v40  ;;  %1541 = vmatprep.subr.bf16.mxu1 %v3848_v41 }
 0x490   :  { %1501 = vmatpush2.bf16.msra.mxu0 %v3843_v44  ;;  %1542 = vmatpush2.bf16.msra.mxu1 %v3846_v45 }
 0x491   :  { %1502 = vmatprep.subr.bf16.mxu0 %v3851_v46  ;;  %1543 = vmatprep.subr.bf16.mxu1 %v3854_v47 }
 0x494   :  { %1503 = vmatpush2.bf16.msra.mxu0 %v3849_v48  ;;  %1544 = vmatpush2.bf16.msra.mxu1 %v3852_v49 }
 0x517   :  { %v1051_v57 = vpop.f32.mrf.mxu0  ;;  %v1092_v58 = vpop.f32.mrf.mxu1 }
 0x518   :  { %v1052_v59 = vadd.f32 %v1051_v57, %v680_v53  ;;  %v1093_v60 = vadd.f32 %v1092_v58, %v688_v54  ;;  %v1140_v53 = vld [vmem:[#allocation6 + $0x7] ss:$8 sm:$0x3] }
 0x519   :  { %v1053_v61 = vpop.f32.mrf.mxu0  ;;  %v1094_v62 = vpop.f32.mrf.mxu1  ;;  %v1145_v54 = vrot.slane %v1140_v53, %v4353_v1 }
 0x51a   :  { %v1099_v2 = vmul.f32 %v1052_v59, %v1052_v59  ;;  %v1101_v4 = vmul.f32 %v1093_v60, %v1093_v60  ;;  %v1054_v5 = vadd.f32 %v1053_v61, %v684_v55  ;;  %v1095_v6 = vadd.f32 %v1094_v62, %v692_v56 }
 0x51b   :  { %v1055_v7 = vpop.f32.mrf.mxu0  ;;  %v1096_v8 = vpop.f32.mrf.mxu1  ;;  %v1149_v55 = vrot.slane %v1140_v53, %v4356_v3 }
 0x51c   :  { %v1103_v9 = vmul.f32 %v1099_v2, %v1052_v59  ;;  %v1105_v10 = vmul.f32 %v1101_v4, %v1093_v60  ;;  %v1100_v11 = vmul.f32 %v1054_v5, %v1054_v5  ;;  %v1102_v12 = vmul.f32 %v1095_v6, %v1095_v6 }
 0x51d   :  { %v1056_v13 = vpop.f32.mrf.mxu0  ;;  %v1097_v14 = vpop.f32.mrf.mxu1 }
 0x51e   :  { %v1107_v15 = vmul.f32 0.044715, %v1103_v9  ;;  %v1109_v16 = vmul.f32 0.044715, %v1105_v10  ;;  %v1104_v17 = vmul.f32 %v1100_v11, %v1054_v5  ;;  %v1106_v18 = vmul.f32 %v1102_v12, %v1095_v6  ;;  %v3855_v11 = vld [vmem:[#allocation9 + $0x370] ss:$8 sps:$4 sm:$0xff]  }
 0x51f   :  { %v3857_v12 = vld [vmem:[#allocation9 + $0x374] ss:$8 sps:$4 sm:$0xff]   ;;  %v3860_v13 = vld [vmem:[#allocation9 + $0x364] ss:$8 sps:$4 sm:$0xff]   ;;  %v3858_v14 = vld [vmem:[#allocation9 + $0x360] ss:$8 sps:$4 sm:$0xff]  }
 0x520   :  { %v1111_v19 = vadd.f32 %v1107_v15, %v1052_v59  ;;  %v1113_v20 = vadd.f32 %v1109_v16, %v1093_v60  ;;  %v1108_v21 = vmul.f32 0.044715, %v1104_v17  ;;  %v1110_v22 = vmul.f32 0.044715, %v1106_v18  ;;  %1939 = vmatprep.subr.bf16.mxu0 %v3857_v12  ;;  %v3863_v15 = vld [vmem:[#allocation9 + $0x354] ss:$8 sps:$4 sm:$0xff]  }
 0x521   :  { %v3861_v16 = vld [vmem:[#allocation9 + $0x350] ss:$8 sps:$4 sm:$0xff]   ;;  %v3866_v17 = vld [vmem:[#allocation9 + $0x344] ss:$8 sps:$4 sm:$0xff]   ;;  %v3864_v18 = vld [vmem:[#allocation9 + $0x340] ss:$8 sps:$4 sm:$0xff]  }
 0x522   :  { %v1115_v23 = vmul.f32 0.7978846, %v1111_v19  ;;  %v1117_v24 = vmul.f32 0.7978846, %v1113_v20  ;;  %v1112_v25 = vadd.f32 %v1108_v21, %v1054_v5  ;;  %v1114_v26 = vadd.f32 %v1110_v22, %v1095_v6  ;;  %v3872_v19 = vld [vmem:[#allocation9 + $0x324] ss:$8 sps:$4 sm:$0xff]  }
 0x523   :  { %v3870_v20 = vld [vmem:[#allocation9 + $0x320] ss:$8 sps:$4 sm:$0xff]   ;;  %v3875_v21 = vld [vmem:[#allocation9 + $0x314] ss:$8 sps:$4 sm:$0xff]   ;;  %v3873_v22 = vld [vmem:[#allocation9 + $0x310] ss:$8 sps:$4 sm:$0xff]  }
 0x524   :  { %4123 = vtanh.f32 %v1115_v23  ;;  %v1116_v27 = vmul.f32 0.7978846, %v1112_v25  ;;  %v1118_v28 = vmul.f32 0.7978846, %v1114_v26  ;;  %v3878_v23 = vld [vmem:[#allocation9 + $0x304] ss:$8 sps:$4 sm:$0xff]  }
 0x525   :  { %4125 = vtanh.f32 %v1117_v24  ;;  %v3876_v24 = vld [vmem:[#allocation9 + $0x300] ss:$8 sps:$4 sm:$0xff]   ;;  %v3881_v25 = vld [vmem:[#allocation9 + $0x3f4] ss:$8 sps:$4 sm:$0xff]   ;;  %v3879_v26 = vld [vmem:[#allocation9 + $0x3f0] ss:$8 sps:$4 sm:$0xff]  }
 0x526   :  { %4127 = vtanh.f32 %v1116_v27  ;;  %v3884_v27 = vld [vmem:[#allocation9 + $0x3e4] ss:$8 sps:$4 sm:$0xff]  }
 0x527   :  { %4129 = vtanh.f32 %v1118_v28  ;;  %v3882_v28 = vld [vmem:[#allocation9 + $0x3e0] ss:$8 sps:$4 sm:$0xff]  }
 0x531   :  { %v4124_v29 = vpop.eup %4123 }
 0x532   :  { %v4126_v30 = vpop.eup %4125  ;;  %v1123_v31 = vadd.f32 1.0, %v4124_v29 }
 0x533   :  { %v4128_v32 = vpop.eup %4127  ;;  %v1125_v33 = vadd.f32 1.0, %v4126_v30 }
 0x534   :  { %v4130_v34 = vpop.eup %4129  ;;  %v1124_v35 = vadd.f32 1.0, %v4128_v32  ;;  %v1127_v36 = vmul.f32 0.5, %v1123_v31 }
 0x535   :  { %v1126_v37 = vadd.f32 1.0, %v4130_v34  ;;  %v1129_v38 = vmul.f32 0.5, %v1125_v33 }
 0x536   :  { %v1128_v39 = vmul.f32 0.5, %v1124_v35  ;;  %v1131_v41 = vmul.f32 %v1127_v36, %v1052_v59  ;;  %v3887_v36 = vld [vmem:[#allocation9 + $0x3d4] ss:$8 sps:$4 sm:$0xff]  }
 0x537   :  { %v1130_v40 = vmul.f32 0.5, %v1126_v37  ;;  %v1133_v45 = vmul.f32 %v1129_v38, %v1093_v60  ;;  %v3885_v37 = vld [vmem:[#allocation9 + $0x3d0] ss:$8 sps:$4 sm:$0xff]   ;;  %v3890_v38 = vld [vmem:[#allocation9 + $0x3c4] ss:$8 sps:$4 sm:$0xff]  }
 0x538   :  { %v1132_v44 = vmul.f32 %v1128_v39, %v1054_v5  ;;  %v1135_v49 = vpack.c.bf16 %v1131_v41, %v1131_v41  ;;  %v3888_v39 = vld [vmem:[#allocation9 + $0x3c0] ss:$8 sps:$4 sm:$0xff]   ;;  %v3891_v41 = vld [vmem:[#allocation9 + $0x3b0] ss:$8 sps:$4 sm:$0xff]  }
 0x539   :  { %v1134_v46 = vmul.f32 %v1130_v40, %v1095_v6  ;;  %v1137_v51 = vpack.c.bf16 %v1133_v45, %v1133_v45  ;;  %v3893_v40 = vld [vmem:[#allocation9 + $0x3b4] ss:$8 sps:$4 sm:$0xff]   ;;  %v3894_v45 = vld [vmem:[#allocation9 + $0x3a0] ss:$8 sps:$4 sm:$0xff]  }
 0x53a   :  { %v1136_v47 = vpack.c.bf16 %v1132_v44, %v1132_v44  ;;  %v3896_v44 = vld [vmem:[#allocation9 + $0x3a4] ss:$8 sps:$4 sm:$0xff]  }
 0x53b   :  { %v1138_v48 = vpack.c.bf16 %v1134_v46, %v1134_v46  ;;  %v3899_v46 = vld [vmem:[#allocation9 + $0x394] ss:$8 sps:$4 sm:$0xff]  }
 0x53c   :  { %1504 = vmatprep.mubr.bf16.mxu0 %v1136_v47  ;;  %v3897_v47 = vld [vmem:[#allocation9 + $0x390] ss:$8 sps:$4 sm:$0xff]  }
 0x53d   :  { %1545 = vmatprep.mubr.bf16.mxu1 %v1138_v48  ;;  %1505 = vmatmul.mubr.bf16.vlgmr.msra.gmra.mxu0 %v1135_v49  ;;  %v3902_v48 = vld [vmem:[#allocation9 + $0x384] ss:$8 sps:$4 sm:$0xff]   ;;  %v3900_v49 = vld [vmem:[#allocation9 + $0x380] ss:$8 sps:$4 sm:$0xff]  }
 0x53e   :  { %1546 = vmatmul.mubr.bf16.vlgmr.msra.gmra.mxu1 %v1137_v51  ;;  %1940 = vmatpush1.bf16.msra.mxu0 %v3855_v11 }
 0x53f   :  { %1941 = vmatprep.subr.bf16.mxu0 %v3860_v13 }
 0x542   :  { %1942 = vmatpush1.bf16.msra.mxu0 %v3858_v14 }
 0x543   :  { %1943 = vmatprep.subr.bf16.mxu0 %v3863_v15 }
 0x546   :  { %1944 = vmatpush1.bf16.msra.mxu0 %v3861_v16 }
 0x547   :  { %1945 = vmatprep.subr.bf16.mxu0 %v3866_v17 }
 0x54a   :  { %1946 = vmatpush1.bf16.msra.mxu0 %v3864_v18 }
 0x5fd   :  { %v1506_v56 = vpop.f32.mrf.mxu0 }
 0x5fe   :  { %v1507_v57 = vadd.f32 %v1506_v56, %v1145_v54  ;;  %v1547_v58 = vpop.f32.mrf.mxu1  ;;  %v1559_v56 = vld [vmem:[#allocation6 + $0x21] ss:$8 sm:$0x3] }
 0x5ff   :  { %v1508_v59 = vpop.f32.mrf.mxu0 }
 0x600   :  { %v1548_v61 = vadd.f32 %v1547_v58, %v1507_v57  ;;  %v1509_v60 = vadd.f32 %v1508_v59, %v1149_v55  ;;  %v1549_v62 = vpop.f32.mrf.mxu1  ;;  %v1557_v55 = vld [vmem:[#allocation6 + $0x20] ss:$8 sm:$0x3] }
 0x601   :  { %v1510_v2 = vpop.f32.mrf.mxu0  ;;  %v1580_v57 = vrot.slane %v1557_v55, %v4353_v1  ;;  %v1584_v58 = vrot.slane %v1557_v55, %v4356_v3  ;;  %v3948_v55 = vld [vmem:[#allocation10 + $0x208] ss:$16 sps:$4 sm:$0xff]  }
 0x602   :  { %v1550_v4 = vadd.f32 %v1549_v62, %v1509_v60  ;;  %v1551_v5 = vpop.f32.mrf.mxu1  ;;  %v1554_v7 = vadd.f32 %v1548_v61, %v4384_v43  ;;  %v3869_v43 = vld [vmem:[#allocation9 + $0x334] ss:$8 sps:$4 sm:$0xff]   ;;  %v1593_v60 = vrot.slane %v1559_v56, %v4353_v1  ;;  %v1597_v62 = vrot.slane %v1559_v56, %v4356_v3 }
 0x603   :  { %v1511_v6 = vpop.f32.mrf.mxu0  ;;  %1947 = vmatprep.subr.bf16.mxu0 %v3869_v43  ;;  %v3953_v56 = vld [vmem:[#allocation10 + $0x3e4] ss:$16 sps:$4 sm:$0xff]  }
 0x604   :  { %v1555_v8 = vadd.f32 %v1550_v4, %v4382_v42  ;;  %v1552_v9 = vpop.f32.mrf.mxu1  ;;  %v3867_v42 = vld [vmem:[#allocation9 + $0x330] ss:$8 sps:$4 sm:$0xff]  }
 0x605   :  { %1948 = vmatpush1.bf16.msra.mxu0 %v3867_v42 }
 0x606   :  { %v1560_v10 = vadd.f32 %v1555_v8, %v1554_v7  ;;  %1949 = vmatprep.subr.bf16.mxu0 %v3872_v19 }
 0x608   :  { %1561 = vadd.xlane.f32.xlu0 %v1560_v10  ;;  %v1767_v10 = vld [vmem:[#allocation6 + $0x22] ss:$8 sm:$0x3] }
 0x609   :  { %1950 = vmatpush1.bf16.msra.mxu0 %v3870_v20  ;;  %v1772_v11 = vrot.slane %v1767_v10, %v4353_v1  ;;  %v1776_v12 = vrot.slane %v1767_v10, %v4356_v3  ;;  %v3903_v20 = vld [vmem:[#allocation10 + $0x2e0] ss:$16 sps:$4 sm:$0xff]  }
 0x60a   :  { %1951 = vmatprep.subr.bf16.mxu0 %v3875_v21  ;;  %v3905_v21 = vld [vmem:[#allocation10 + $0x2e4] ss:$16 sps:$4 sm:$0xff]  }
 0x60b   :  { %2373 = vmatprep.subr.bf16.mxu1 %v3905_v21  ;;  %v3983_v21 = vld [vmem:[#allocation10 + $0x344] ss:$16 sps:$4 sm:$0xff]  }
 0x60c   :  { %2374 = vmatpush1.bf16.msra.mxu1 %v3903_v20  ;;  %v3978_v20 = vld [vmem:[#allocation10 + $0x368] ss:$16 sps:$4 sm:$0xff]  }
 0x60d   :  { %1952 = vmatpush1.bf16.msra.mxu0 %v3873_v22  ;;  %v3906_v22 = vld [vmem:[#allocation10 + $0x2e8] ss:$16 sps:$4 sm:$0xff]  }
 0x60e   :  { %1953 = vmatprep.subr.bf16.mxu0 %v3878_v23  ;;  %v3908_v23 = vld [vmem:[#allocation10 + $0x2ec] ss:$16 sps:$4 sm:$0xff]  }
 0x611   :  { %1954 = vmatpush1.bf16.msra.mxu0 %v3876_v24  ;;  %v3911_v24 = vld [vmem:[#allocation10 + $0x2c4] ss:$16 sps:$4 sm:$0xff]  }
 0x612   :  { %1955 = vmatprep.subr.bf16.mxu0 %v3881_v25  ;;  %v3914_v25 = vld [vmem:[#allocation10 + $0x2cc] ss:$16 sps:$4 sm:$0xff]   ;;  %2375 = vmatprep.subr.bf16.mxu1 %v3911_v24  ;;  %v3984_v24 = vld [vmem:[#allocation10 + $0x348] ss:$16 sps:$4 sm:$0xff]  }
 0x615   :  { %1956 = vmatpush2.bf16.msra.mxu0 %v3879_v26  ;;  %v3909_v26 = vld [vmem:[#allocation10 + $0x2c0] ss:$16 sps:$4 sm:$0xff]  }
 0x616   :  { %1957 = vmatprep.subr.bf16.mxu0 %v3884_v27  ;;  %v3912_v27 = vld [vmem:[#allocation10 + $0x2c8] ss:$16 sps:$4 sm:$0xff]   ;;  %2376 = vmatpush1.bf16.msra.mxu1 %v3909_v26  ;;  %v3992_v26 = vld [vmem:[#allocation10 + $0x32c] ss:$16 sps:$4 sm:$0xff]  }
 0x619   :  { %1958 = vmatpush2.bf16.msra.mxu0 %v3882_v28  ;;  %v3917_v28 = vld [vmem:[#allocation10 + $0x2a4] ss:$16 sps:$4 sm:$0xff]  }
 0x61a   :  { %1959 = vmatprep.subr.bf16.mxu0 %v3887_v36  ;;  %2377 = vmatprep.subr.bf16.mxu1 %v3917_v28  ;;  %v3929_v36 = vld [vmem:[#allocation10 + $0x264] ss:$16 sps:$4 sm:$0xff]   ;;  %v3990_v28 = vld [vmem:[#allocation10 + $0x328] ss:$16 sps:$4 sm:$0xff]  }
 0x61d   :  { %1960 = vmatpush2.bf16.msra.mxu0 %v3885_v37  ;;  %v3932_v37 = vld [vmem:[#allocation10 + $0x26c] ss:$16 sps:$4 sm:$0xff]  }
 0x61e   :  { %1961 = vmatprep.subr.bf16.mxu0 %v3890_v38  ;;  %v3927_v38 = vld [vmem:[#allocation10 + $0x260] ss:$16 sps:$4 sm:$0xff]  }
 0x621   :  { %1962 = vmatpush2.bf16.msra.mxu0 %v3888_v39  ;;  %v3930_v39 = vld [vmem:[#allocation10 + $0x268] ss:$16 sps:$4 sm:$0xff]  }
 0x622   :  { %1963 = vmatprep.subr.bf16.mxu0 %v3893_v40  ;;  %v3935_v40 = vld [vmem:[#allocation10 + $0x244] ss:$16 sps:$4 sm:$0xff]  }
 0x625   :  { %1964 = vmatpush2.bf16.msra.mxu0 %v3891_v41  ;;  %v3938_v41 = vld [vmem:[#allocation10 + $0x24c] ss:$16 sps:$4 sm:$0xff]  }
 0x626   :  { %1965 = vmatprep.subr.bf16.mxu0 %v3896_v44  ;;  %v3933_v44 = vld [vmem:[#allocation10 + $0x240] ss:$16 sps:$4 sm:$0xff]  }
 0x629   :  { %1966 = vmatpush2.bf16.msra.mxu0 %v3894_v45  ;;  %v3936_v45 = vld [vmem:[#allocation10 + $0x248] ss:$16 sps:$4 sm:$0xff]  }
 0x62a   :  { %1967 = vmatprep.subr.bf16.mxu0 %v3899_v46  ;;  %v3941_v46 = vld [vmem:[#allocation10 + $0x224] ss:$16 sps:$4 sm:$0xff]  }
 0x62d   :  { %1968 = vmatpush2.bf16.msra.mxu0 %v3897_v47  ;;  %v3944_v47 = vld [vmem:[#allocation10 + $0x22c] ss:$16 sps:$4 sm:$0xff]  }
 0x62e   :  { %1969 = vmatprep.subr.bf16.mxu0 %v3902_v48  ;;  %v3939_v48 = vld [vmem:[#allocation10 + $0x220] ss:$16 sps:$4 sm:$0xff]  }
 0x631   :  { %1970 = vmatpush2.bf16.msra.mxu0 %v3900_v49  ;;  %v3942_v49 = vld [vmem:[#allocation10 + $0x228] ss:$16 sps:$4 sm:$0xff]  }
 0x632   :  { %2414 = vmatprep.subr.bf16.mxu0 %v3908_v23  ;;  %v3981_v23 = vld [vmem:[#allocation10 + $0x340] ss:$16 sps:$4 sm:$0xff]  }
 0x691   :  { %v1562_v29 = vpop.xlane.xlu0 %1561 }
 0x692   :  { %v1563_v30 = vmul.f32 0.00390625, %v1562_v29  ;;  %v3920_v29 = vld [vmem:[#allocation10 + $0x2ac] ss:$16 sps:$4 sm:$0xff]  }
 0x694   :  { %v1564_v31 = vsub.f32 %v1554_v7, %v1563_v30  ;;  %v1565_v32 = vsub.f32 %v1555_v8, %v1563_v30  ;;  %v3915_v30 = vld [vmem:[#allocation10 + $0x2a0] ss:$16 sps:$4 sm:$0xff]  }
 0x695   :  { %2378 = vmatpush1.bf16.msra.mxu1 %v3915_v30  ;;  %v3998_v30 = vld [vmem:[#allocation10 + $0x30c] ss:$16 sps:$4 sm:$0xff]  }
 0x696   :  { %v1566_v33 = vmul.f32 %v1564_v31, %v1564_v31  ;;  %v1567_v34 = vmul.f32 %v1565_v32, %v1565_v32 }
 0x698   :  { %v1568_v35 = vadd.f32 %v1567_v34, %v1566_v33  ;;  %v3926_v33 = vld [vmem:[#allocation10 + $0x28c] ss:$16 sps:$4 sm:$0xff]   ;;  %v3921_v34 = vld [vmem:[#allocation10 + $0x280] ss:$16 sps:$4 sm:$0xff]  }
 0x69a   :  { %1569 = vadd.xlane.f32.xlu1 %v1568_v35  ;;  %v3924_v35 = vld [vmem:[#allocation10 + $0x288] ss:$16 sps:$4 sm:$0xff]  }
 0x723   :  { %v1570_v51 = vpop.xlane.xlu1 %1569 }
 0x724   :  { %v1571_v53 = vmul.f32 0.00390625, %v1570_v51  ;;  %v3947_v51 = vld [vmem:[#allocation10 + $0x204] ss:$16 sps:$4 sm:$0xff]  }
 0x726   :  { %v1572_v54 = vadd.f32 1e-05, %v1571_v53  ;;  %v3950_v53 = vld [vmem:[#allocation10 + $0x20c] ss:$16 sps:$4 sm:$0xff]  }
 0x728   :  { %4131 = vrsqrt.f32 %v1572_v54  ;;  %v3945_v54 = vld [vmem:[#allocation10 + $0x200] ss:$16 sps:$4 sm:$0xff]  }
 0x735   :  { %v4132_v59 = vpop.eup %4131 }
 0x736   :  { %v1575_v61 = vmul.f32 %v4132_v59, %v1565_v32  ;;  %v1574_v2 = vmul.f32 %v4132_v59, %v1564_v31  ;;  %v3918_v31 = vld [vmem:[#allocation10 + $0x2a8] ss:$16 sps:$4 sm:$0xff]   ;;  %v3923_v32 = vld [vmem:[#allocation10 + $0x284] ss:$16 sps:$4 sm:$0xff]  }
 0x737   :  { %2379 = vmatprep.subr.bf16.mxu1 %v3923_v32  ;;  %v3954_v59 = vld [vmem:[#allocation10 + $0x3e8] ss:$16 sps:$4 sm:$0xff]  }
 0x738   :  { %v1588_v4 = vmul.f32 %v1584_v58, %v1575_v61  ;;  %v1587_v5 = vmul.f32 %v1580_v57, %v1574_v2  ;;  %2380 = vmatpush1.bf16.msra.mxu1 %v3921_v34  ;;  %v3956_v57 = vld [vmem:[#allocation10 + $0x3ec] ss:$16 sps:$4 sm:$0xff]   ;;  %v3951_v58 = vld [vmem:[#allocation10 + $0x3e0] ss:$16 sps:$4 sm:$0xff]   ;;  %v3959_v61 = vld [vmem:[#allocation10 + $0x3c4] ss:$16 sps:$4 sm:$0xff]  }
 0x739   :  { %2381 = vmatprep.subr.bf16.mxu1 %v3929_v36  ;;  %v3960_v2 = vld [vmem:[#allocation10 + $0x3c8] ss:$16 sps:$4 sm:$0xff]   ;;  %v4004_v34 = vld [vmem:[#allocation9 + $0x574] ss:$8 sps:$4 sm:$0xff]  }
 0x73a   :  { %v1601_v6 = vadd.f32 %v1597_v62, %v1588_v4  ;;  %v1600_v7 = vadd.f32 %v1593_v60, %v1587_v5  ;;  %v3962_v60 = vld [vmem:[#allocation10 + $0x3cc] ss:$16 sps:$4 sm:$0xff]   ;;  %v3957_v62 = vld [vmem:[#allocation10 + $0x3c0] ss:$16 sps:$4 sm:$0xff]   ;;  %v3996_v32 = vld [vmem:[#allocation10 + $0x308] ss:$16 sps:$4 sm:$0xff]  }
 0x73c   :  { %v1765_v8 = vpack.c.bf16 %v1601_v6, %v1601_v6  ;;  %v1764_v9 = vpack.c.bf16 %v1600_v7, %v1600_v7  ;;  %2382 = vmatpush1.bf16.msra.mxu1 %v3927_v38  ;;  %v1983_v38 = vld [vmem:[#allocation6 + $0x23] ss:$8 sm:$0x3] }
 0x73d   :  { %2383 = vmatprep.subr.bf16.mxu1 %v3935_v40  ;;  %v2006_v40 = vrot.slane %v1983_v38, %v4353_v1 }
 0x73e   :  { %1971 = vmatprep.mubr.bf16.mxu0 %v1765_v8 }
 0x73f   :  { %1972 = vmatmul.mubr.bf16.vlgmr.msra.gmra.mxu0 %v1764_v9 }
 0x740   :  { %2415 = vmatpush1.bf16.msra.mxu0 %v3906_v22  ;;  %2384 = vmatpush1.bf16.msra.mxu1 %v3933_v44  ;;  %v3986_v22 = vld [vmem:[#allocation10 + $0x34c] ss:$16 sps:$4 sm:$0xff]  }
 0x741   :  { %2416 = vmatprep.subr.bf16.mxu0 %v3914_v25  ;;  %2385 = vmatprep.subr.bf16.mxu1 %v3941_v46  ;;  %v3989_v25 = vld [vmem:[#allocation10 + $0x324] ss:$16 sps:$4 sm:$0xff]  }
 0x744   :  { %2417 = vmatpush1.bf16.msra.mxu0 %v3912_v27  ;;  %2386 = vmatpush1.bf16.msra.mxu1 %v3939_v48  ;;  %v3987_v27 = vld [vmem:[#allocation10 + $0x320] ss:$16 sps:$4 sm:$0xff]  }
 0x745   :  { %2418 = vmatprep.subr.bf16.mxu0 %v3920_v29  ;;  %2387 = vmatprep.subr.bf16.mxu1 %v3947_v51  ;;  %v3995_v29 = vld [vmem:[#allocation10 + $0x304] ss:$16 sps:$4 sm:$0xff]  }
 0x748   :  { %2419 = vmatpush1.bf16.msra.mxu0 %v3918_v31  ;;  %2388 = vmatpush1.bf16.msra.mxu1 %v3945_v54  ;;  %v3993_v31 = vld [vmem:[#allocation10 + $0x300] ss:$16 sps:$4 sm:$0xff]  }
 0x749   :  { %2420 = vmatprep.subr.bf16.mxu0 %v3926_v33  ;;  %2389 = vmatprep.subr.bf16.mxu1 %v3953_v56  ;;  %v4001_v33 = vld [vmem:[#allocation9 + $0x474] ss:$8 sps:$4 sm:$0xff]  }
 0x74c   :  { %2421 = vmatpush1.bf16.msra.mxu0 %v3924_v35  ;;  %2390 = vmatpush2.bf16.msra.mxu1 %v3951_v58  ;;  %v4002_v58 = vld [vmem:[#allocation9 + $0x570] ss:$8 sps:$4 sm:$0xff]  }
 0x74d   :  { %2422 = vmatprep.subr.bf16.mxu0 %v3932_v37  ;;  %2391 = vmatprep.subr.bf16.mxu1 %v3959_v61  ;;  %v4010_v61 = vld [vmem:[#allocation9 + $0x564] ss:$8 sps:$4 sm:$0xff]  }
 0x750   :  { %2423 = vmatpush1.bf16.msra.mxu0 %v3930_v39  ;;  %2392 = vmatpush2.bf16.msra.mxu1 %v3957_v62  ;;  %v1985_v39 = vld [vmem:[#allocation6 + $0x24] ss:$8 sm:$0x3]  ;;  %v4008_v62 = vld [vmem:[#allocation9 + $0x560] ss:$8 sps:$4 sm:$0xff]  }
 0x751   :  { %2424 = vmatprep.subr.bf16.mxu0 %v3938_v41  ;;  %v2010_v41 = vrot.slane %v1983_v38, %v4356_v3  ;;  %v2019_v46 = vrot.slane %v1985_v39, %v4353_v1  ;;  %v4067_v38 = vld [vmem:[#allocation9 + $0x4c4] ss:$8 sps:$4 sm:$0xff]  }
 0x754   :  { %2425 = vmatpush1.bf16.msra.mxu0 %v3936_v45 }
 0x755   :  { %2426 = vmatprep.subr.bf16.mxu0 %v3944_v47  ;;  %v2023_v47 = vrot.slane %v1985_v39, %v4356_v3  ;;  %v4068_v39 = vld [vmem:[#allocation9 + $0x5c0] ss:$8 sps:$4 sm:$0xff]  }
 0x758   :  { %2427 = vmatpush1.bf16.msra.mxu0 %v3942_v49 }
 0x759   :  { %2428 = vmatprep.subr.bf16.mxu0 %v3950_v53 }
 0x75c   :  { %2429 = vmatpush1.bf16.msra.mxu0 %v3948_v55 }
 0x75d   :  { %2430 = vmatprep.subr.bf16.mxu0 %v3956_v57  ;;  %v3999_v57 = vld [vmem:[#allocation9 + $0x470] ss:$8 sps:$4 sm:$0xff]  }
 0x760   :  { %2431 = vmatpush2.bf16.msra.mxu0 %v3954_v59  ;;  %v4007_v59 = vld [vmem:[#allocation9 + $0x464] ss:$8 sps:$4 sm:$0xff]  }
 0x761   :  { %2432 = vmatprep.subr.bf16.mxu0 %v3962_v60  ;;  %v4005_v60 = vld [vmem:[#allocation9 + $0x460] ss:$8 sps:$4 sm:$0xff]  }
 0x764   :  { %2433 = vmatpush2.bf16.msra.mxu0 %v3960_v2  ;;  %v4013_v2 = vld [vmem:[#allocation9 + $0x454] ss:$8 sps:$4 sm:$0xff]  }
 0x7ff   :  { %v1973_v13 = vpop.f32.mrf.mxu0 }
 0x800   :  { %v1974_v14 = vadd.f32 %v1973_v13, %v1772_v11  ;;  %v3965_v11 = vld [vmem:[#allocation10 + $0x3a4] ss:$16 sps:$4 sm:$0xff]   ;;  %v3963_v13 = vld [vmem:[#allocation10 + $0x3a0] ss:$16 sps:$4 sm:$0xff]  }
 0x801   :  { %v1975_v15 = vpop.f32.mrf.mxu0  ;;  %2393 = vmatprep.subr.bf16.mxu1 %v3965_v11  ;;  %v4025_v11 = vld [vmem:[#allocation9 + $0x434] ss:$8 sps:$4 sm:$0xff]  }
 0x802   :  { %v1976_v16 = vadd.f32 %v1975_v15, %v1776_v12  ;;  %v4408_v18 = vadd.f32 %v1974_v14, %v1600_v7  ;;  %v3968_v12 = vld [vmem:[#allocation10 + $0x3ac] ss:$16 sps:$4 sm:$0xff]   ;;  %v3966_v14 = vld [vmem:[#allocation10 + $0x3a8] ss:$16 sps:$4 sm:$0xff]   ;;  %v3971_v15 = vld [vmem:[#allocation10 + $0x384] ss:$16 sps:$4 sm:$0xff]   ;;  %2394 = vmatpush2.bf16.msra.mxu1 %v3963_v13 }
 0x803   :  { %v1977_v17 = vpop.f32.mrf.mxu0  ;;  %2434 = vmatprep.subr.bf16.mxu0 %v3968_v12  ;;  %2395 = vmatprep.subr.bf16.mxu1 %v3971_v15  ;;  %v4028_v12 = vld [vmem:[#allocation9 + $0x534] ss:$8 sps:$4 sm:$0xff]   ;;  %v4023_v13 = vld [vmem:[#allocation9 + $0x430] ss:$8 sps:$4 sm:$0xff]   ;;  %v4031_v15 = vld [vmem:[#allocation9 + $0x424] ss:$8 sps:$4 sm:$0xff]  }
 0x804   :  { %v4410_v43 = vadd.f32 %v1976_v16, %v1601_v6  ;;  %2435 = vmatpush2.bf16.msra.mxu0 %v3966_v14  ;;  %v3969_v16 = vld [vmem:[#allocation10 + $0x380] ss:$16 sps:$4 sm:$0xff]   ;;  %v3972_v17 = vld [vmem:[#allocation10 + $0x388] ss:$16 sps:$4 sm:$0xff]  }
 0x805   :  { %v1978_v42 = vpop.f32.mrf.mxu0  ;;  %v4026_v14 = vld [vmem:[#allocation9 + $0x530] ss:$8 sps:$4 sm:$0xff]  }
 0x806   :  { %v1986_v19 = vadd.f32 %v4410_v43, %v4408_v18  ;;  %v3980_v42 = vld [vmem:[#allocation10 + $0x36c] ss:$16 sps:$4 sm:$0xff]   ;;  %2396 = vmatpush2.bf16.msra.mxu1 %v3969_v16 }
 0x807   :  { %v4034_v16 = vld [vmem:[#allocation9 + $0x524] ss:$8 sps:$4 sm:$0xff]  }
 0x808   :  { %1987 = vadd.xlane.f32.xlu0 %v1986_v19  ;;  %v3975_v19 = vld [vmem:[#allocation10 + $0x360] ss:$16 sps:$4 sm:$0xff]  }
 0x891   :  { %v1988_v4 = vpop.xlane.xlu0 %1987 }
 0x892   :  { %v1989_v5 = vmul.f32 0.00390625, %v1988_v4  ;;  %v4016_v4 = vld [vmem:[#allocation9 + $0x554] ss:$8 sps:$4 sm:$0xff]  }
 0x894   :  { %v4415_v6 = vsub.f32 %v4408_v18, %v1989_v5  ;;  %v4418_v7 = vsub.f32 %v4410_v43, %v1989_v5  ;;  %v3974_v18 = vld [vmem:[#allocation10 + $0x38c] ss:$16 sps:$4 sm:$0xff]   ;;  %v3977_v43 = vld [vmem:[#allocation10 + $0x364] ss:$16 sps:$4 sm:$0xff]   ;;  %v4011_v5 = vld [vmem:[#allocation9 + $0x450] ss:$8 sps:$4 sm:$0xff]  }
 0x895   :  { %2436 = vmatprep.subr.bf16.mxu0 %v3974_v18  ;;  %2397 = vmatprep.subr.bf16.mxu1 %v3977_v43  ;;  %v4032_v18 = vld [vmem:[#allocation9 + $0x520] ss:$8 sps:$4 sm:$0xff]   ;;  %v4037_v43 = vld [vmem:[#allocation9 + $0x414] ss:$8 sps:$4 sm:$0xff]  }
 0x896   :  { %v1992_v8 = vmul.f32 %v4415_v6, %v4415_v6  ;;  %v1993_v9 = vmul.f32 %v4418_v7, %v4418_v7  ;;  %2437 = vmatpush2.bf16.msra.mxu0 %v3972_v17  ;;  %2398 = vmatpush2.bf16.msra.mxu1 %v3975_v19  ;;  %v4029_v17 = vld [vmem:[#allocation9 + $0x420] ss:$8 sps:$4 sm:$0xff]   ;;  %v4035_v19 = vld [vmem:[#allocation9 + $0x410] ss:$8 sps:$4 sm:$0xff]  }
 0x897   :  { %2438 = vmatprep.subr.bf16.mxu0 %v3980_v42  ;;  %2399 = vmatprep.subr.bf16.mxu1 %v3983_v21  ;;  %v4040_v42 = vld [vmem:[#allocation9 + $0x514] ss:$8 sps:$4 sm:$0xff]   ;;  %v4043_v21 = vld [vmem:[#allocation9 + $0x404] ss:$8 sps:$4 sm:$0xff]  }
 0x898   :  { %v1994_v10 = vadd.f32 %v1993_v9, %v1992_v8  ;;  %v4022_v8 = vld [vmem:[#allocation9 + $0x544] ss:$8 sps:$4 sm:$0xff]   ;;  %v4017_v9 = vld [vmem:[#allocation9 + $0x440] ss:$8 sps:$4 sm:$0xff]  }
 0x89a   :  { %1995 = vadd.xlane.f32.xlu1 %v1994_v10  ;;  %2439 = vmatpush2.bf16.msra.mxu0 %v3978_v20  ;;  %v4020_v10 = vld [vmem:[#allocation9 + $0x540] ss:$8 sps:$4 sm:$0xff]   ;;  %v4038_v20 = vld [vmem:[#allocation9 + $0x510] ss:$8 sps:$4 sm:$0xff]  }
 0x89b   :  { %2440 = vmatprep.subr.bf16.mxu0 %v3986_v22  ;;  %2400 = vmatpush2.bf16.msra.mxu1 %v3981_v23  ;;  %v4046_v22 = vld [vmem:[#allocation9 + $0x504] ss:$8 sps:$4 sm:$0xff]   ;;  %v4041_v23 = vld [vmem:[#allocation9 + $0x400] ss:$8 sps:$4 sm:$0xff]  }
 0x89c   :  { %2401 = vmatprep.subr.bf16.mxu1 %v3989_v25  ;;  %v4049_v25 = vld [vmem:[#allocation9 + $0x4f4] ss:$8 sps:$4 sm:$0xff]  }
 0x89e   :  { %2441 = vmatpush2.bf16.msra.mxu0 %v3984_v24  ;;  %v4044_v24 = vld [vmem:[#allocation9 + $0x500] ss:$8 sps:$4 sm:$0xff]  }
 0x89f   :  { %2442 = vmatprep.subr.bf16.mxu0 %v3992_v26  ;;  %2402 = vmatpush2.bf16.msra.mxu1 %v3987_v27  ;;  %v4052_v26 = vld [vmem:[#allocation9 + $0x5f4] ss:$8 sps:$4 sm:$0xff]   ;;  %v4047_v27 = vld [vmem:[#allocation9 + $0x4f0] ss:$8 sps:$4 sm:$0xff]  }
 0x8a0   :  { %2403 = vmatprep.subr.bf16.mxu1 %v3995_v29  ;;  %v4055_v29 = vld [vmem:[#allocation9 + $0x4e4] ss:$8 sps:$4 sm:$0xff]  }
 0x8a2   :  { %2443 = vmatpush2.bf16.msra.mxu0 %v3990_v28  ;;  %v4050_v28 = vld [vmem:[#allocation9 + $0x5f0] ss:$8 sps:$4 sm:$0xff]  }
 0x8a3   :  { %2444 = vmatprep.subr.bf16.mxu0 %v3998_v30  ;;  %2404 = vmatpush2.bf16.msra.mxu1 %v3993_v31  ;;  %v4058_v30 = vld [vmem:[#allocation9 + $0x5e4] ss:$8 sps:$4 sm:$0xff]   ;;  %v4053_v31 = vld [vmem:[#allocation9 + $0x4e0] ss:$8 sps:$4 sm:$0xff]  }
 0x8a4   :  { %2828 = vmatprep.subr.bf16.mxu1 %v4001_v33  ;;  %v4061_v33 = vld [vmem:[#allocation9 + $0x4d4] ss:$8 sps:$4 sm:$0xff]  }
 0x8a6   :  { %2445 = vmatpush2.bf16.msra.mxu0 %v3996_v32  ;;  %v4056_v32 = vld [vmem:[#allocation9 + $0x5e0] ss:$8 sps:$4 sm:$0xff]  }
 0x8a7   :  { %2869 = vmatprep.subr.bf16.mxu0 %v4004_v34  ;;  %v4064_v34 = vld [vmem:[#allocation9 + $0x5d4] ss:$8 sps:$4 sm:$0xff]  }
 0x923   :  { %v1996_v35 = vpop.xlane.xlu1 %1995 }
 0x924   :  { %v1997_v36 = vmul.f32 0.00390625, %v1996_v35  ;;  %v4059_v35 = vld [vmem:[#allocation9 + $0x4d0] ss:$8 sps:$4 sm:$0xff]  }
 0x926   :  { %v1998_v37 = vadd.f32 1e-05, %v1997_v36  ;;  %v4062_v36 = vld [vmem:[#allocation9 + $0x5d0] ss:$8 sps:$4 sm:$0xff]  }
 0x928   :  { %4133 = vrsqrt.f32 %v1998_v37  ;;  %v4065_v37 = vld [vmem:[#allocation9 + $0x4c0] ss:$8 sps:$4 sm:$0xff]  }
 0x935   :  { %v4134_v44 = vpop.eup %4133 }
 0x936   :  { %v2001_v45 = vmul.f32 %v4134_v44, %v4418_v7  ;;  %v2000_v48 = vmul.f32 %v4134_v44, %v4415_v6  ;;  %v4014_v6 = vld [vmem:[#allocation9 + $0x550] ss:$8 sps:$4 sm:$0xff]   ;;  %v4019_v7 = vld [vmem:[#allocation9 + $0x444] ss:$8 sps:$4 sm:$0xff]   ;;  %v4076_v44 = vld [vmem:[#allocation9 + $0x5b4] ss:$8 sps:$4 sm:$0xff]  }
 0x938   :  { %v2014_v49 = vmul.f32 %v2010_v41, %v2001_v45  ;;  %v2013_v51 = vmul.f32 %v2006_v40, %v2000_v48  ;;  %v4070_v40 = vld [vmem:[#allocation9 + $0x5c4] ss:$8 sps:$4 sm:$0xff]   ;;  %v4073_v41 = vld [vmem:[#allocation9 + $0x4b4] ss:$8 sps:$4 sm:$0xff]   ;;  %v4071_v45 = vld [vmem:[#allocation9 + $0x4b0] ss:$8 sps:$4 sm:$0xff]  }
 0x939   :  { %v4082_v48 = vld [vmem:[#allocation9 + $0x5a4] ss:$8 sps:$4 sm:$0xff]  }
 0x93a   :  { %v4430_v53 = vadd.f32 %v2023_v47, %v2014_v49  ;;  %v4432_v54 = vadd.f32 %v2019_v46, %v2013_v51  ;;  %v4074_v46 = vld [vmem:[#allocation9 + $0x5b0] ss:$8 sps:$4 sm:$0xff]   ;;  %v4079_v47 = vld [vmem:[#allocation9 + $0x4a4] ss:$8 sps:$4 sm:$0xff]   ;;  %v4077_v49 = vld [vmem:[#allocation9 + $0x4a0] ss:$8 sps:$4 sm:$0xff]  }
 0x93b   :  { %v4080_v51 = vld [vmem:[#allocation9 + $0x5a0] ss:$8 sps:$4 sm:$0xff]  }
 0x93c   :  { %v2029_v55 = vpack.c.bf16 %v4430_v53, %v4430_v53  ;;  %v2028_v56 = vpack.c.bf16 %v4432_v54, %v4432_v54 }
 0x93e   :  { %2405 = vmatprep.mubr.bf16.mxu1 %v2029_v55  ;;  %2446 = vmatprep.mubr.bf16.mxu0 %v2029_v55  ;;  %v4085_v55 = vld [vmem:[#allocation9 + $0x494] ss:$8 sps:$4 sm:$0xff]  }
 0x93f   :  { %2406 = vmatmul.mubr.bf16.vlgmr.msra.gmra.mxu1 %v2028_v56  ;;  %2447 = vmatmul.mubr.bf16.vlgmr.msra.gmra.mxu0 %v2028_v56  ;;  %v4088_v56 = vld [vmem:[#allocation9 + $0x594] ss:$8 sps:$4 sm:$0xff]  }
 0x940   :  { %2829 = vmatpush1.bf16.msra.mxu1 %v3999_v57  ;;  %2870 = vmatpush1.bf16.msra.mxu0 %v4002_v58  ;;  %v4083_v57 = vld [vmem:[#allocation9 + $0x490] ss:$8 sps:$4 sm:$0xff]  }
 0x941   :  { %2830 = vmatprep.subr.bf16.mxu1 %v4007_v59  ;;  %2871 = vmatprep.subr.bf16.mxu0 %v4010_v61  ;;  %v4086_v58 = vld [vmem:[#allocation9 + $0x590] ss:$8 sps:$4 sm:$0xff]   ;;  %v4091_v59 = vld [vmem:[#allocation9 + $0x484] ss:$8 sps:$4 sm:$0xff]  }
 0x942   :  { %v4094_v61 = vld [vmem:[#allocation9 + $0x584] ss:$8 sps:$4 sm:$0xff]  }
 0x944   :  { %2831 = vmatpush1.bf16.msra.mxu1 %v4005_v60  ;;  %2872 = vmatpush1.bf16.msra.mxu0 %v4008_v62  ;;  %v4089_v60 = vld [vmem:[#allocation9 + $0x480] ss:$8 sps:$4 sm:$0xff]  }
 0x945   :  { %2832 = vmatprep.subr.bf16.mxu1 %v4013_v2  ;;  %2873 = vmatprep.subr.bf16.mxu0 %v4016_v4  ;;  %v4092_v62 = vld [vmem:[#allocation9 + $0x580] ss:$8 sps:$4 sm:$0xff]   ;;  %v2031_v2 = vld [vmem:[#allocation6 + $0x25] ss:$8 sm:$0xf] }
 0x946   :  { %v2036_v4 = vrot.slane %v2031_v2, %v4353_v1 }
 0x948   :  { %2833 = vmatpush1.bf16.msra.mxu1 %v4011_v5  ;;  %2874 = vmatpush1.bf16.msra.mxu0 %v4014_v6  ;;  %v2044_v5 = vrot.slane %v2031_v2, %v687_v50  ;;  %v2040_v6 = vrot.slane %v2031_v2, %v4356_v3 }
 0x949   :  { %2834 = vmatprep.subr.bf16.mxu1 %v4019_v7  ;;  %2875 = vmatprep.subr.bf16.mxu0 %v4022_v8  ;;  %v2048_v7 = vrot.slane %v2031_v2, %v691_v52 }
 0x94c   :  { %2835 = vmatpush1.bf16.msra.mxu1 %v4017_v9  ;;  %2876 = vmatpush1.bf16.msra.mxu0 %v4020_v10 }
 0x94d   :  { %2836 = vmatprep.subr.bf16.mxu1 %v4025_v11  ;;  %2877 = vmatprep.subr.bf16.mxu0 %v4028_v12 }
 0x950   :  { %2837 = vmatpush1.bf16.msra.mxu1 %v4023_v13  ;;  %2878 = vmatpush1.bf16.msra.mxu0 %v4026_v14 }
 0x951   :  { %2838 = vmatprep.subr.bf16.mxu1 %v4031_v15  ;;  %2879 = vmatprep.subr.bf16.mxu0 %v4034_v16 }
 0x954   :  { %2839 = vmatpush1.bf16.msra.mxu1 %v4029_v17  ;;  %2880 = vmatpush1.bf16.msra.mxu0 %v4032_v18 }
 0x955   :  { %2840 = vmatprep.subr.bf16.mxu1 %v4037_v43  ;;  %2881 = vmatprep.subr.bf16.mxu0 %v4040_v42 }
 0x958   :  { %2841 = vmatpush1.bf16.msra.mxu1 %v4035_v19  ;;  %2882 = vmatpush1.bf16.msra.mxu0 %v4038_v20 }
 0x959   :  { %2842 = vmatprep.subr.bf16.mxu1 %v4043_v21  ;;  %2883 = vmatprep.subr.bf16.mxu0 %v4046_v22 }
 0x95c   :  { %2843 = vmatpush1.bf16.msra.mxu1 %v4041_v23  ;;  %2884 = vmatpush1.bf16.msra.mxu0 %v4044_v24 }
 0x95d   :  { %2844 = vmatprep.subr.bf16.mxu1 %v4049_v25  ;;  %2885 = vmatprep.subr.bf16.mxu0 %v4052_v26 }
 0x960   :  { %2845 = vmatpush2.bf16.msra.mxu1 %v4047_v27  ;;  %2886 = vmatpush2.bf16.msra.mxu0 %v4050_v28 }
 0x961   :  { %2846 = vmatprep.subr.bf16.mxu1 %v4055_v29  ;;  %2887 = vmatprep.subr.bf16.mxu0 %v4058_v30 }
 0x964   :  { %2847 = vmatpush2.bf16.msra.mxu1 %v4053_v31  ;;  %2888 = vmatpush2.bf16.msra.mxu0 %v4056_v32 }
 0x965   :  { %2848 = vmatprep.subr.bf16.mxu1 %v4061_v33  ;;  %2889 = vmatprep.subr.bf16.mxu0 %v4064_v34 }
 0x968   :  { %2849 = vmatpush2.bf16.msra.mxu1 %v4059_v35  ;;  %2890 = vmatpush2.bf16.msra.mxu0 %v4062_v36 }
 0x969   :  { %2850 = vmatprep.subr.bf16.mxu1 %v4067_v38  ;;  %2891 = vmatprep.subr.bf16.mxu0 %v4070_v40 }
 0x96c   :  { %2851 = vmatpush2.bf16.msra.mxu1 %v4065_v37  ;;  %2892 = vmatpush2.bf16.msra.mxu0 %v4068_v39 }
 0x96d   :  { %2852 = vmatprep.subr.bf16.mxu1 %v4073_v41  ;;  %2893 = vmatprep.subr.bf16.mxu0 %v4076_v44 }
 0x970   :  { %2853 = vmatpush2.bf16.msra.mxu1 %v4071_v45  ;;  %2894 = vmatpush2.bf16.msra.mxu0 %v4074_v46 }
 0x971   :  { %2854 = vmatprep.subr.bf16.mxu1 %v4079_v47  ;;  %2895 = vmatprep.subr.bf16.mxu0 %v4082_v48 }
 0x974   :  { %2855 = vmatpush2.bf16.msra.mxu1 %v4077_v49  ;;  %2896 = vmatpush2.bf16.msra.mxu0 %v4080_v51 }
 0x975   :  { %2856 = vmatprep.subr.bf16.mxu1 %v4085_v55  ;;  %2897 = vmatprep.subr.bf16.mxu0 %v4088_v56 }
 0x978   :  { %2857 = vmatpush2.bf16.msra.mxu1 %v4083_v57  ;;  %2898 = vmatpush2.bf16.msra.mxu0 %v4086_v58 }
 0x979   :  { %2858 = vmatprep.subr.bf16.mxu1 %v4091_v59  ;;  %2899 = vmatprep.subr.bf16.mxu0 %v4094_v61 }
 0x97c   :  { %2859 = vmatpush2.bf16.msra.mxu1 %v4089_v60  ;;  %2900 = vmatpush2.bf16.msra.mxu0 %v4092_v62  ;;  %v2496_v60 = vld [vmem:[#allocation6 + $0x26] ss:$8 sm:$0x3] }
 0x97d   :  { %3575 = vmatprep.subr.bf16.mxu0 %v4289_v0  ;;  %v2501_v62 = vrot.slane %v2496_v60, %v4353_v1  ;;  %v2505_v2 = vrot.slane %v2496_v60, %v4356_v3  ;;  %v4095_v1 = vld [vmem:[#allocation7 + $0x98] sm:$0xff]  }
 0x97e   :  { %v4096_v3 = vld [vmem:[#allocation7 + $0x58] sm:$0xff]   ;;  %3532 = vmatprep.subr.bf16.mxu1 %v4095_v1 }
 0x9ff   :  { %v2407_v8 = vpop.f32.mrf.mxu1  ;;  %v2448_v9 = vpop.f32.mrf.mxu0 }
 0xa00   :  { %v2408_v10 = vadd.f32 %v2407_v8, %v2036_v4  ;;  %v2449_v11 = vadd.f32 %v2448_v9, %v2044_v5 }
 0xa01   :  { %v2409_v12 = vpop.f32.mrf.mxu1  ;;  %v2450_v13 = vpop.f32.mrf.mxu0 }
 0xa02   :  { %v2455_v14 = vmul.f32 %v2408_v10, %v2408_v10  ;;  %v2457_v15 = vmul.f32 %v2449_v11, %v2449_v11  ;;  %v2410_v16 = vadd.f32 %v2409_v12, %v2040_v6  ;;  %v2451_v17 = vadd.f32 %v2450_v13, %v2048_v7 }
 0xa03   :  { %v2411_v18 = vpop.f32.mrf.mxu1  ;;  %v2452_v43 = vpop.f32.mrf.mxu0 }
 0xa04   :  { %v2459_v42 = vmul.f32 %v2455_v14, %v2408_v10  ;;  %v2461_v19 = vmul.f32 %v2457_v15, %v2449_v11  ;;  %v2456_v50 = vmul.f32 %v2410_v16, %v2410_v16  ;;  %v2458_v20 = vmul.f32 %v2451_v17, %v2451_v17  ;;  %v4097_v43 = vld [vmem:[#allocation7 + $0x90] sm:$0xff]  }
 0xa05   :  { %v2412_v21 = vpop.f32.mrf.mxu1  ;;  %v2453_v22 = vpop.f32.mrf.mxu0 }
 0xa06   :  { %v2463_v63 = vmul.f32 0.044715, %v2459_v42  ;;  %v2465_v52 = vmul.f32 0.044715, %v2461_v19  ;;  %v2460_v23 = vmul.f32 %v2456_v50, %v2410_v16  ;;  %v2462_v24 = vmul.f32 %v2458_v20, %v2451_v17  ;;  %v4098_v42 = vld [vmem:[#allocation7 + $0x50] sm:$0xff]   ;;  %v4099_v19 = vld [vmem:[#allocation7 + $0x88] sm:$0xff]  }
 0xa08   :  { %v2467_v25 = vadd.f32 %v2463_v63, %v2408_v10  ;;  %v2469_v26 = vadd.f32 %v2465_v52, %v2449_v11  ;;  %v2464_v27 = vmul.f32 0.044715, %v2460_v23  ;;  %v2466_v28 = vmul.f32 0.044715, %v2462_v24  ;;  %v4100_v52 = vld [vmem:[#allocation7 + $0x48] sm:$0xff]   ;;  %v4101_v23 = vld [vmem:[#allocation7 + $0x80] sm:$0xff]  }
 0xa09   :  { %v4102_v24 = vld [vmem:[#allocation7 + $0x40] sm:$0xff]  }
 0xa0a   :  { %v2471_v29 = vmul.f32 0.7978846, %v2467_v25  ;;  %v2473_v30 = vmul.f32 0.7978846, %v2469_v26  ;;  %v2468_v31 = vadd.f32 %v2464_v27, %v2410_v16  ;;  %v2470_v32 = vadd.f32 %v2466_v28, %v2451_v17  ;;  %v4103_v25 = vld [vmem:[#allocation7 + $0x78] sm:$0xff]   ;;  %v4105_v27 = vld [vmem:[#allocation7 + $0x70] sm:$0xff]  }
 0xa0b   :  { %v4104_v26 = vld [vmem:[#allocation7 + $0x38] sm:$0xff]   ;;  %v4106_v28 = vld [vmem:[#allocation7 + $0x30] sm:$0xff]  }
 0xa0c   :  { %4135 = vtanh.f32 %v2471_v29  ;;  %v2472_v33 = vmul.f32 0.7978846, %v2468_v31  ;;  %v2474_v34 = vmul.f32 0.7978846, %v2470_v32  ;;  %v4107_v29 = vld [vmem:[#allocation7 + $0x68] sm:$0xff]   ;;  %v4109_v31 = vld [vmem:[#allocation7 + $0x60] sm:$0xff]  }
 0xa0d   :  { %4137 = vtanh.f32 %v2473_v30  ;;  %v4108_v30 = vld [vmem:[#allocation7 + $0x28] sm:$0xff]   ;;  %v4110_v32 = vld [vmem:[#allocation7 + $0x20] sm:$0xff]  }
 0xa0e   :  { %4139 = vtanh.f32 %v2472_v33 }
 0xa0f   :  { %4141 = vtanh.f32 %v2474_v34 }
 0xa19   :  { %v4136_v35 = vpop.eup %4135 }
 0xa1a   :  { %v4138_v36 = vpop.eup %4137  ;;  %v2479_v37 = vadd.f32 1.0, %v4136_v35 }
 0xa1b   :  { %v4140_v38 = vpop.eup %4139  ;;  %v2481_v39 = vadd.f32 1.0, %v4138_v36 }
 0xa1c   :  { %v4142_v40 = vpop.eup %4141  ;;  %v2480_v41 = vadd.f32 1.0, %v4140_v38  ;;  %v2483_v44 = vmul.f32 0.5, %v2479_v37 }
 0xa1d   :  { %v2482_v45 = vadd.f32 1.0, %v4142_v40  ;;  %v2485_v46 = vmul.f32 0.5, %v2481_v39 }
 0xa1e   :  { %v2484_v47 = vmul.f32 0.5, %v2480_v41  ;;  %v2487_v49 = vmul.f32 %v2483_v44, %v2408_v10 }
 0xa1f   :  { %v2486_v48 = vmul.f32 0.5, %v2482_v45  ;;  %v2489_v55 = vmul.f32 %v2485_v46, %v2449_v11  ;;  %v2930_v45 = vld [vmem:[#allocation6 + $0x41] ss:$0 sm:$0xff] }
 0xa20   :  { %v2488_v51 = vmul.f32 %v2484_v47, %v2410_v16  ;;  %v2491_v59 = vpack.c.bf16 %v2487_v49, %v2487_v49 }
 0xa21   :  { %v2490_v56 = vmul.f32 %v2486_v48, %v2451_v17  ;;  %v2493_v61 = vpack.c.bf16 %v2489_v55, %v2489_v55  ;;  %v4111_v55 = vld [vmem:[#allocation7 + $0xd8] sm:$0xff]  }
 0xa22   :  { %v2492_v57 = vpack.c.bf16 %v2488_v51, %v2488_v51 }
 0xa23   :  { %v2494_v58 = vpack.c.bf16 %v2490_v56, %v2490_v56  ;;  %v4112_v56 = vld [vmem:[#allocation7 + $0xd0] sm:$0xff]  }
 0xa24   :  { %2860 = vmatprep.mubr.bf16.mxu1 %v2492_v57  ;;  %v4113_v57 = vld [vmem:[#allocation7 + $0xc8] sm:$0xff]  }
 0xa25   :  { %2901 = vmatprep.mubr.bf16.mxu0 %v2494_v58  ;;  %2861 = vmatmul.mubr.bf16.vlgmr.msra.gmra.mxu1 %v2491_v59 }
 0xa26   :  { %2902 = vmatmul.mubr.bf16.vlgmr.msra.gmra.mxu0 %v2493_v61  ;;  %3533 = vmatpush3.bf16.msra.mxu1 %v4096_v3 }
 0xa27   :  { %3591 = vmatprep.mubr.msk.bf16.mxu0 %vm4290_vm0, %v4289_v0  ;;  %3534 = vmatprep.subr.bf16.mxu1 %v4097_v43 }
 0xa28   :  { %3576 = vmatpush3.bf16.msra.mxu0 %v4111_v55 }
 0xa29   :  { %3577 = vmatprep.subr.bf16.mxu0 %v4289_v0 }
 0xa2a   :  { %3535 = vmatpush3.bf16.msra.mxu1 %v4098_v42 }
 0xa2b   :  { %3536 = vmatprep.subr.bf16.mxu1 %v4099_v19 }
 0xa2c   :  { %3578 = vmatpush3.bf16.msra.mxu0 %v4112_v56 }
 0xa2d   :  { %3579 = vmatprep.subr.bf16.mxu0 %v4289_v0 }
 0xa2e   :  { %3537 = vmatpush3.bf16.msra.mxu1 %v4100_v52 }
 0xa2f   :  { %3538 = vmatprep.subr.bf16.mxu1 %v4101_v23 }
 0xa30   :  { %3580 = vmatpush3.bf16.msra.mxu0 %v4113_v57 }
 0xa31   :  { %3581 = vmatprep.subr.bf16.mxu0 %v4289_v0 }
 0xa32   :  { %3539 = vmatpush3.bf16.msra.mxu1 %v4102_v24 }
 0xa33   :  { %3540 = vmatprep.subr.bf16.mxu1 %v4103_v25 }
 0xa36   :  { %3541 = vmatpush3.bf16.msra.mxu1 %v4104_v26 }
 0xa37   :  { %3542 = vmatprep.subr.bf16.mxu1 %v4105_v27 }
 0xa3a   :  { %3543 = vmatpush3.bf16.msra.mxu1 %v4106_v28 }
 0xa3b   :  { %3544 = vmatprep.subr.bf16.mxu1 %v4107_v29 }
 0xa3e   :  { %3545 = vmatpush3.bf16.msra.mxu1 %v4108_v30 }
 0xa3f   :  { %3546 = vmatprep.subr.bf16.mxu1 %v4109_v31 }
 0xa42   :  { %3547 = vmatpush3.bf16.msra.mxu1 %v4110_v32 }
 0xae5   :  { %v2862_v4 = vpop.f32.mrf.mxu1 }
 0xae6   :  { %v2863_v5 = vadd.f32 %v2862_v4, %v2501_v62  ;;  %v2903_v6 = vpop.f32.mrf.mxu0  ;;  %v4114_v62 = vld [vmem:[#allocation7 + $0xc0] sm:$0xff]   ;;  %v4116_v4 = vld [vmem:[#allocation7 + $0xb0] sm:$0xff]  }
 0xae7   :  { %v2864_v7 = vpop.f32.mrf.mxu1  ;;  %3582 = vmatpush3.bf16.msra.mxu0 %v4114_v62 }
 0xae8   :  { %v2904_v8 = vadd.f32 %v2903_v6, %v2863_v5  ;;  %v2865_v9 = vadd.f32 %v2864_v7, %v2505_v2  ;;  %v2905_v10 = vpop.f32.mrf.mxu0  ;;  %v4115_v2 = vld [vmem:[#allocation7 + $0xb8] sm:$0xff]   ;;  %3583 = vmatprep.subr.bf16.mxu0 %v4289_v0  ;;  %v4117_v5 = vld [vmem:[#allocation7 + $0xa8] sm:$0xff]   ;;  %v4118_v6 = vld [vmem:[#allocation7 + $0xa0] sm:$0xff]  }
 0xae9   :  { %v2866_v11 = vpop.f32.mrf.mxu1 }
 0xaea   :  { %v2906_v12 = vadd.f32 %v2905_v10, %v2865_v9  ;;  %v2907_v13 = vpop.f32.mrf.mxu0  ;;  %v2910_v15 = vadd.f32 %v2904_v8, %v4432_v54 }
 0xaeb   :  { %v2867_v14 = vpop.f32.mrf.mxu1  ;;  %3584 = vmatpush3.bf16.msra.mxu0 %v4115_v2  ;;  %v3080_v13 = vld [vmem:[#allocation6 + $0x42] ss:$0 sm:$0xff] }
 0xaec   :  { %v2911_v16 = vadd.f32 %v2906_v12, %v4430_v53  ;;  %v2908_v17 = vpop.f32.mrf.mxu0  ;;  %3585 = vmatprep.subr.bf16.mxu0 %v4289_v0 }
 0xaee   :  { %v2912_v18 = vadd.f32 %v2911_v16, %v2910_v15 }
 0xaef   :  { %3586 = vmatpush3.bf16.msra.mxu0 %v4116_v4 }
 0xaf0   :  { %2913 = vadd.xlane.f32.xlu0 %v2912_v18  ;;  %3587 = vmatprep.subr.bf16.mxu0 %v4289_v0 }
 0xaf3   :  { %3588 = vmatpush3.bf16.msra.mxu0 %v4117_v5 }
 0xaf4   :  { %3589 = vmatprep.subr.bf16.mxu0 %v4289_v0 }
 0xaf7   :  { %3590 = vmatpush3.bf16.msra.mxu0 %v4118_v6 }
 0xb79   :  { %v2914_v50 = vpop.xlane.xlu0 %2913 }
 0xb7a   :  { %v2915_v20 = vmul.f32 0.00390625, %v2914_v50 }
 0xb7c   :  { %v2916_v21 = vsub.f32 %v2910_v15, %v2915_v20  ;;  %v2917_v22 = vsub.f32 %v2911_v16, %v2915_v20 }
 0xb7e   :  { %v2918_v54 = vmul.f32 %v2916_v21, %v2916_v21  ;;  %v2919_v63 = vmul.f32 %v2917_v22, %v2917_v22 }
 0xb80   :  { %v2920_v53 = vadd.f32 %v2919_v63, %v2918_v54 }
 0xb82   :  { %2921 = vadd.xlane.f32.xlu1 %v2920_v53 }
 0xc0b   :  { %v2922_v33 = vpop.xlane.xlu1 %2921 }
 0xc0c   :  { %v2923_v34 = vmul.f32 0.00390625, %v2922_v33 }
 0xc0e   :  { %v2924_v35 = vadd.f32 1e-05, %v2923_v34 }
 0xc10   :  { %4143 = vrsqrt.f32 %v2924_v35 }
 0xc1d   :  { %v4144_v36 = vpop.eup %4143 }
 0xc1e   :  { %v2927_v37 = vmul.f32 %v4144_v36, %v2917_v22  ;;  %v2926_v38 = vmul.f32 %v4144_v36, %v2916_v21 }
 0xc20   :  { %v2929_v39 = vpack.c.bf16 %v2927_v37, %v2927_v37  ;;  %v2928_v40 = vpack.c.bf16 %v2926_v38, %v2926_v38 }
 0xc22   :  { %3059 = vmatprep.mubr.bf16.mxu1 %v2929_v39 }
 0xc23   :  { %3060 = vmatmul.mubr.bf16.vlgmr.msra.gmra.mxu1 %v2928_v40 }
 0xce3   :  { %v3548_v41 = vpop.f32.mrf.mxu1 }
 0xce5   :  { %v3549_v44 = vpop.f32.mrf.mxu1 }
 0xce6   :  { %v3550_v46 = vadd.f32 %v3549_v44, %v3548_v41 }
 0xce7   :  { %v3551_v47 = vpop.f32.mrf.mxu1 }
 0xce8   :  { %v3062_v48 = vadd.f32 %v3550_v46, %v2930_v45 }
 0xce9   :  { %v3552_v49 = vpop.f32.mrf.mxu1 }
 0xcea   :  { %v3067_v51 = vmax.f32 %v3062_v48, 0.0 }
 0xcec   :  { %3068 = vadd.xlane.f32.xlu0 %v3067_v51 }
 0xd75   :  { %v3069_v58 = vpop.xlane.xlu0 %3068 }
 0xd76   :  { %v3070_v59 = vmul.f32 0.0078125, %v3069_v58 }
 0xd78   :  { %v3071_v61 = vsub.f32 %v3067_v51, %v3070_v59 }
 0xd7a   :  { %v3072_v60 = vmul.f32 %v3071_v61, %v3071_v61 }
 0xd7c   :  { %3073 = vadd.xlane.f32.xlu1 %v3072_v60 }
 0xe05   :  { %v3074_v7 = vpop.xlane.xlu1 %3073 }
 0xe06   :  { %v3075_v8 = vmul.f32 0.0078125, %v3074_v7 }
 0xe08   :  { %v3076_v9 = vadd.f32 1e-05, %v3075_v8 }
 0xe0a   :  { %4145 = vrsqrt.f32 %v3076_v9 }
 0xe17   :  { %v4146_v10 = vpop.eup %4145 }
 0xe18   :  { %v3078_v11 = vmul.f32 %v4146_v10, %v3071_v61 }
 0xe1a   :  { %v3079_v12 = vpack.c.bf16 %v3078_v11, %v3078_v11 }
 0xe1c   :  { %3592 = vmatmul.mubr.bf16.vlgmr.msra.gmra.mxu0 %v3079_v12 }
 0xedc   :  { %v3163_v14 = vpop.f32.mrf.mxu0 }
 0xedd   :  { %v3164_v15 = vadd.f32 %v3163_v14, %v3080_v13 }
 0xede   :  { %v3593_v16 = vpop.f32.mrf.mxu0 }
 0xedf   :  { %3169 = vst [vmem:[%s4467_s6] sm:$0xff] %v3164_v15 }
 0xee0   :  { %v3166_v17 = vpop.f32.mrf.mxu0 }
 0xee2   :  { %v3594_v18 = vpop.f32.mrf.mxu0 }
 0xee3   :  { %3174 = vsyncpa [#allocation3], 1 }
 0xee4   :  { %3175 = vsyncpa [#allocation5], 1 }
 0xee5   :  { %3176 = vsyncpa [#allocation8], 1 }
 0xee6   :  { %3177 = vsyncpa [#allocation11], 1 }

</bundles_post_ra>
